<compile_context>
chip_gen: v7x
topology: tpu7x:2x2x1
jax: 0.10.0
libtpu: 0.0.40
codegen_flags: <defaults>
</compile_context>

<pallas_src>
import functools

import jax
import jax.numpy as jnp
import numpy as np
from jax.experimental import pallas as pl
from jax.experimental.pallas import tpu as pltpu


def _round_up(x, m):
    return ((x + m - 1) // m) * m


# ----------------------------------------------------------------------------
# Pallas kernel: one (batch, time-block) slab of single_step_forward
# ----------------------------------------------------------------------------
def _decoder_block_kernel(x_ref, gate_ref, rel_rs_ref, rel_recT_ref,
                          w1r_ref, w1s_ref, b1f_ref, w2bd_ref, b2f_ref,
                          wo1x_ref, wo1a_ref, bo1_ref, wo2_ref, bo2_ref,
                          wo3_ref, bo3_ref,
                          out_ref,
                          recv_scr, send_scr, agg_scr,
                          *, edge_types, msg_out):
    n_pad, e_pad = rel_recT_ref.shape
    rows_n = x_ref.shape[2]
    tb = rows_n // n_pad

    x = x_ref[0, 0]                     # (TB*N_pad, D)   rows = (t, atom)
    gate = gate_ref[0]                  # (E_pad, ET*M)   per-batch, time-invariant
    rel_rs = rel_rs_ref[...]            # (2*E_pad, N_pad)  [rel_rec ; rel_send]
    rel_recT = rel_recT_ref[...]        # (N_pad, E_pad)

    # 1) Edge gather: one small MXU matmul per timestep with the stacked
    #    (recv;send) incidence matrix (resident in VMEM, no Kronecker blow-up).
    for t in range(tb):
        x_t = x[t * n_pad:(t + 1) * n_pad, :]                            # (N_pad, D)
        rs_t = jnp.dot(rel_rs, x_t, preferred_element_type=jnp.float32)  # (2E_pad, D)
        recv_scr[t * e_pad:(t + 1) * e_pad, :] = rs_t[:e_pad]
        send_scr[t * e_pad:(t + 1) * e_pad, :] = rs_t[e_pad:]

    # 2) msg_fc1 fused over all edge types, concat-free (split-K GEMM),
    #    batched over all (t, edge) rows at once.
    h = (jnp.dot(recv_scr[...], w1r_ref[...], preferred_element_type=jnp.float32)
         + jnp.dot(send_scr[...], w1s_ref[...], preferred_element_type=jnp.float32)
         + b1f_ref[...])
    h = jnp.maximum(h, 0.0)                                              # (TB*E_pad, ET*H)

    # 3) msg_fc2 fused over edge types with a block-diagonal weight: one GEMM.
    msgs = jnp.maximum(
        jnp.dot(h, w2bd_ref[...], preferred_element_type=jnp.float32) + b2f_ref[...],
        0.0)                                                             # (TB*E_pad, ET*M)

    # 4) rel_type gating (lane-expanded gate table, pure VPU) + sum over edge
    #    types + per-timestep aggregation back onto receiver nodes.
    for t in range(tb):
        gated = msgs[t * e_pad:(t + 1) * e_pad, :] * gate                # (E_pad, ET*M)
        summed = gated[:, :msg_out]
        for i in range(1, edge_types):
            summed = summed + gated[:, i * msg_out:(i + 1) * msg_out]    # (E_pad, M)
        agg_scr[t * n_pad:(t + 1) * n_pad, :] = jnp.dot(
            rel_recT, summed, preferred_element_type=jnp.float32)        # (N_pad, M)

    # 5) Output MLP (concat-free) + residual, batched over all (t, atom) rows.
    p = (jnp.dot(x, wo1x_ref[...], preferred_element_type=jnp.float32)
         + jnp.dot(agg_scr[...], wo1a_ref[...], preferred_element_type=jnp.float32)
         + bo1_ref[...])
    p = jnp.maximum(p, 0.0)
    p = jnp.maximum(
        jnp.dot(p, wo2_ref[...], preferred_element_type=jnp.float32) + bo2_ref[...], 0.0)
    p = jnp.dot(p, wo3_ref[...], preferred_element_type=jnp.float32) + bo3_ref[...]

    # NOTE: with n_in_node=4 these stores are lane-masked (4/128 lanes); a
    # transposed (D, TB*N_pad) store layout would be lane-dense but costs an
    # in-kernel XLU transpose that does not pay off at this feature width.
    out_ref[0, 0] = x + p


def _single_step_pallas(x4, gates, rel_rs, rel_recT, kp, edge_types, msg_out):
    """x4: (B, nb, TB*N_pad, D) -> (B, nb, TB*N_pad, D)."""
    B, nb, RN, D = x4.shape
    E_pad, ETM = gates.shape[1], gates.shape[2]
    N_pad = rel_recT.shape[0]
    TB = RN // N_pad

    kernel = functools.partial(_decoder_block_kernel,
                               edge_types=edge_types, msg_out=msg_out)
    cmap = lambda b, t: (0, 0)

    return pl.pallas_call(
        kernel,
        out_shape=jax.ShapeDtypeStruct((B, nb, RN, D), jnp.float32),
        grid_spec=pltpu.PrefetchScalarGridSpec(
            num_scalar_prefetch=0,
            grid=(B, nb),
            in_specs=[
                pl.BlockSpec((1, 1, RN, D), lambda b, t: (b, t, 0, 0)),   # x slab
                pl.BlockSpec((1, E_pad, ETM), lambda b, t: (b, 0, 0)),    # expanded gates
                pl.BlockSpec(rel_rs.shape, cmap),                         # [rel_rec; rel_send]
                pl.BlockSpec(rel_recT.shape, cmap),                       # rel_rec^T
                pl.BlockSpec(kp["w1r"].shape, cmap),                      # msg_fc1 W (recv, fused)
                pl.BlockSpec(kp["w1s"].shape, cmap),                      # msg_fc1 W (send, fused)
                pl.BlockSpec(kp["b1f"].shape, cmap),                      # msg_fc1 b (fused)
                pl.BlockSpec(kp["w2bd"].shape, cmap),                     # msg_fc2 W (block-diag)
                pl.BlockSpec(kp["b2f"].shape, cmap),                      # msg_fc2 b (fused)
                pl.BlockSpec(kp["wo1x"].shape, cmap),                     # out_fc1 W (x half)
                pl.BlockSpec(kp["wo1a"].shape, cmap),                     # out_fc1 W (agg half)
                pl.BlockSpec(kp["bo1"].shape, cmap),                      # out_fc1 b
                pl.BlockSpec(kp["wo2"].shape, cmap),                      # out_fc2 W
                pl.BlockSpec(kp["bo2"].shape, cmap),                      # out_fc2 b
                pl.BlockSpec(kp["wo3"].shape, cmap),                      # out_fc3 W
                pl.BlockSpec(kp["bo3"].shape, cmap),                      # out_fc3 b
            ],
            out_specs=pl.BlockSpec((1, 1, RN, D), lambda b, t: (b, t, 0, 0)),
            scratch_shapes=[
                pltpu.VMEM((TB * E_pad, D), jnp.float32),       # gathered receivers
                pltpu.VMEM((TB * E_pad, D), jnp.float32),       # gathered senders
                pltpu.VMEM((TB * N_pad, msg_out), jnp.float32), # aggregated messages
            ],
        ),
        compiler_params=pltpu.CompilerParams(
            dimension_semantics=("parallel", "parallel"),
            # default scoped VMEM is 16 MiB (v5e) / 32 MiB (v6e+); raise it so a
            # larger time block compiles, but stay below v7x's 64 MiB physical.
            vmem_limit_bytes=48 * 1024 * 1024),
    )(x4, gates, rel_rs, rel_recT,
      kp["w1r"], kp["w1s"], kp["b1f"], kp["w2bd"], kp["b2f"],
      kp["wo1x"], kp["wo1a"], kp["bo1"], kp["wo2"], kp["bo2"],
      kp["wo3"], kp["bo3"])


def _pick_time_block(Tp, tb_cap, E_pad, N_pad, D, ET, H, M, n_hid, batch,
                     act_budget_bytes=20 * 1024 * 1024):
    """Largest TB whose in-flight activations stay under a VMEM budget."""
    def act_bytes(tb):
        rows_e, rows_n = tb * E_pad, tb * N_pad
        per_e = 2 * D + ET * H + 2 * ET * M          # recv/send scratch, h, msgs, gated
        per_n = 2 * D + M + 2 * n_hid                # x, agg scratch, hidden layers
        return 4 * (rows_e * per_e + rows_n * per_n)

    tb = max(1, min(Tp, tb_cap))
    while tb > 1 and act_bytes(tb) > act_budget_bytes:
        tb -= 1
    # v7x has 2 TensorCores sharing the grid: keep >= 2 units of work if possible.
    if batch * (-(-Tp // tb)) < 2 and Tp > 1:
        tb = min(tb, max(1, (Tp + 1) // 2))
    return tb


# ----------------------------------------------------------------------------
# Full MLPDecoder.forward (glue + constant prep in jitted JAX, hot path in Pallas)
# ----------------------------------------------------------------------------
@functools.partial(jax.jit,
                   static_argnames=("pred_steps", "skip_first", "block_timesteps"))
def mlp_decoder_forward(inputs, rel_type, rel_rec, rel_send, params,
                        pred_steps=1, skip_first=False, block_timesteps=32):
    # inputs: [B, num_atoms, T, n_in_node]; rel_type: [B, E, edge_types]
    B, N, T, D = inputs.shape
    E, ET = rel_type.shape[1], rel_type.shape[2]
    assert pred_steps <= T

    H = params["w1"].shape[-1]
    M = params["w2"].shape[-1]
    n_hid = params["wo2"].shape[-1]

    # ---- static geometry: pad atoms / edges to sublane multiples ----------
    N_pad = _round_up(N, 8)
    E_pad = _round_up(E, 8)

    x = jnp.transpose(inputs, (0, 2, 1, 3))            # (B, T, N, D)
    last_pred = x[:, 0::pred_steps]                    # (B, Tp, N, D)
    Tp = last_pred.shape[1]

    TB = _pick_time_block(Tp, block_timesteps, E_pad, N_pad, D, ET, H, M, n_hid, B)
    Tp_pad = _round_up(Tp, TB)
    nb = Tp_pad // TB

    # ---- constant prep (pure jnp, tiny; fused/cached under jit) -----------
    rel_rec_p = jnp.zeros((E_pad, N_pad), jnp.float32).at[:E, :N].set(rel_rec)
    rel_send_p = jnp.zeros((E_pad, N_pad), jnp.float32).at[:E, :N].set(rel_send)
    rel_rs = jnp.concatenate([rel_rec_p, rel_send_p], axis=0)     # (2*E_pad, N_pad)
    rel_recT = rel_rec_p.T                                        # (N_pad, E_pad)

    w1, b1 = params["w1"], params["b1"]                  # (ET, 2D, H), (ET, 1, H)
    w1r = jnp.concatenate([w1[i, :D, :] for i in range(ET)], axis=1)   # (D, ET*H)
    w1s = jnp.concatenate([w1[i, D:, :] for i in range(ET)], axis=1)   # (D, ET*H)
    b1f = jnp.concatenate([b1[i] for i in range(ET)], axis=1)          # (1, ET*H)

    w2 = params["w2"]                                    # (ET, H, M)
    w2bd = jnp.zeros((ET * H, ET * M), jnp.float32)
    for i in range(ET):
        w2bd = w2bd.at[i * H:(i + 1) * H, i * M:(i + 1) * M].set(w2[i])
    b2f = jnp.concatenate([params["b2"][i] for i in range(ET)], axis=1)  # (1, ET*M)

    kp = dict(w1r=w1r, w1s=w1s, b1f=b1f, w2bd=w2bd, b2f=b2f,
              wo1x=params["wo1"][:D], wo1a=params["wo1"][D:],
              bo1=params["bo1"], wo2=params["wo2"], bo2=params["bo2"],
              wo3=params["wo3"], bo3=params["bo3"])

    # rel_type gate, lane-expanded to (B, E_pad, ET*M) — time-invariant, never
    # replicated over timesteps in HBM.  skip_first => zero the type-0 gate.
    gate = rel_type.astype(jnp.float32)
    if skip_first:
        type_mask = np.ones((ET,), np.float32)
        type_mask[0] = 0.0
        gate = gate * jnp.asarray(type_mask)[None, None, :]
    gate = jnp.repeat(gate, M, axis=-1)                  # (B, E, ET*M), type-major lanes
    gate = jnp.pad(gate, ((0, 0), (0, E_pad - E), (0, 0)))

    # ---- activations: pad timesteps & atoms, flatten rows per time block --
    lp = jnp.pad(last_pred,
                 ((0, 0), (0, Tp_pad - Tp), (0, N_pad - N), (0, 0)))
    cur = lp.reshape(B, nb, TB * N_pad, D)

    preds = []
    for _ in range(pred_steps):
        cur = _single_step_pallas(cur, gate, rel_rs, rel_recT, kp, ET, M)
        preds.append(cur.reshape(B, Tp_pad, N_pad, D)[:, :Tp, :N])

    # output[:, i::pred_steps] = preds[i]  -> interleave along time
    stacked = jnp.stack(preds, axis=2)                   # (B, Tp, P, N, D)
    output = stacked.reshape(B, Tp * pred_steps, N, D)
    return jnp.transpose(output, (0, 2, 1, 3))           # (B, N, Tp*P, D)


# ----------------------------------------------------------------------------
# Pure-JAX reference (mirrors the PyTorch module) for verification
# ----------------------------------------------------------------------------
def _reference_forward(inputs, rel_type, rel_rec, rel_send, params,
                       pred_steps=1, skip_first=False):
    B, N, T, D = inputs.shape
    E, ET = rel_type.shape[1], rel_type.shape[2]
    x = jnp.transpose(inputs, (0, 2, 1, 3))
    rt = jnp.broadcast_to(rel_type[:, None], (B, T, E, ET))

    def single_step(xi, rti):
        receivers = jnp.einsum('en,btnd->bted', rel_rec, xi)
        senders = jnp.einsum('en,btnd->bted', rel_send, xi)
        pre_msg = jnp.concatenate([receivers, senders], axis=-1)
        all_msgs = jnp.zeros(pre_msg.shape[:-1] + (params["w2"].shape[-1],), jnp.float32)
        start = 1 if skip_first else 0
        for i in range(start, ET):
            m = jnp.maximum(pre_msg @ params["w1"][i] + params["b1"][i], 0.0)
            m = jnp.maximum(m @ params["w2"][i] + params["b2"][i], 0.0)
            all_msgs = all_msgs + m * rti[..., i:i + 1]
        agg = jnp.einsum('bted,en->btnd', all_msgs, rel_rec)
        aug = jnp.concatenate([xi, agg], axis=-1)
        p = jnp.maximum(aug @ params["wo1"] + params["bo1"], 0.0)
        p = jnp.maximum(p @ params["wo2"] + params["bo2"], 0.0)
        p = p @ params["wo3"] + params["bo3"]
        return xi + p

    last = x[:, 0::pred_steps]
    crt = rt[:, 0::pred_steps]
    preds = []
    for _ in range(pred_steps):
        last = single_step(last, crt)
        preds.append(last)
    stacked = jnp.stack(preds, axis=2)
    out = stacked.reshape(B, last.shape[1] * pred_steps, N, D)
    return jnp.transpose(out, (0, 2, 1, 3))


# ----------------------------------------------------------------------------
# Deterministic parameter init (PyTorch nn.Linear-style uniform bounds)
# ----------------------------------------------------------------------------
def init_params(key, n_in_node, edge_types, msg_hid, msg_out, n_hid):
    def linear(k, fan_in, fan_out):
        kw, kb = jax.random.split(k)
        bound = 1.0 / np.sqrt(fan_in)
        w = jax.random.uniform(kw, (fan_in, fan_out), jnp.float32, -bound, bound)
        b = jax.random.uniform(kb, (1, fan_out), jnp.float32, -bound, bound)
        return w, b

    keys = jax.random.split(key, 2 * edge_types + 3)
    w1s, b1s, w2s, b2s = [], [], [], []
    for i in range(edge_types):
        w, b = linear(keys[2 * i], 2 * n_in_node, msg_hid)
        w1s.append(w); b1s.append(b)
        w, b = linear(keys[2 * i + 1], msg_hid, msg_out)
        w2s.append(w); b2s.append(b)
    wo1, bo1 = linear(keys[-3], n_in_node + msg_out, n_hid)
    wo2, bo2 = linear(keys[-2], n_hid, n_hid)
    wo3, bo3 = linear(keys[-1], n_hid, n_in_node)
    return dict(
        w1=jnp.stack(w1s), b1=jnp.stack(b1s),
        w2=jnp.stack(w2s), b2=jnp.stack(b2s),
        wo1=wo1, bo1=bo1, wo2=wo2, bo2=bo2, wo3=wo3, bo3=bo3,
    )


if __name__ == "__main__":
    # Small shapes consistent with the module's forward.
    B, N_ATOMS, T, D = 2, 5, 8, 4          # batch, atoms, timesteps, n_in_node
    EDGE_TYPES, MSG_HID, MSG_OUT, N_HID = 2, 32, 32, 32

    key = jax.random.PRNGKey(0)
    k_in, k_rt, k_par = jax.random.split(key, 3)

    # Off-diagonal one-hot relation matrices (as in NRI).
    edges = [(i, j) for i in range(N_ATOMS) for j in range(N_ATOMS) if i != j]
    E = len(edges)
    rel_rec_np = np.zeros((E, N_ATOMS), np.float32)
    rel_send_np = np.zeros((E, N_ATOMS), np.float32)
    for e_idx, (i, j) in enumerate(edges):
        rel_rec_np[e_idx, i] = 1.0
        rel_send_np[e_idx, j] = 1.0
    rel_rec = jnp.asarray(rel_rec_np)
    rel_send = jnp.asarray(rel_send_np)

    inputs = jax.random.normal(k_in, (B, N_ATOMS, T, D), jnp.float32)
    rel_type = jax.nn.softmax(
        jax.random.normal(k_rt, (B, E, EDGE_TYPES), jnp.float32), axis=-1)

    params = init_params(k_par, D, EDGE_TYPES, MSG_HID, MSG_OUT, N_HID)

    for pred_steps, skip_first in [(1, False), (1, True), (2, False)]:
        out = mlp_decoder_forward(inputs, rel_type, rel_rec, rel_send, params,
                                  pred_steps=pred_steps, skip_first=skip_first)
        out = jax.block_until_ready(out)
        ref = _reference_forward(inputs, rel_type, rel_rec, rel_send, params,
                                 pred_steps=pred_steps, skip_first=skip_first)
        np.testing.assert_allclose(np.asarray(out), np.asarray(ref),
                                   rtol=1e-4, atol=1e-4)

    print("KERNEL_OK")
</pallas_src>

<mosaic_0001>
module attributes {stable_mosaic.version = 11 : i64} {
  func.func @_decoder_block_kernel(%arg0: i32, %arg1: i32, %arg2: memref<1x1x64x4xf32, #tpu.memory_space<vmem>>, %arg3: memref<1x24x64xf32, #tpu.memory_space<vmem>>, %arg4: memref<48x8xf32, #tpu.memory_space<vmem>>, %arg5: memref<8x24xf32, #tpu.memory_space<vmem>>, %arg6: memref<4x64xf32, #tpu.memory_space<vmem>>, %arg7: memref<4x64xf32, #tpu.memory_space<vmem>>, %arg8: memref<1x64xf32, #tpu.memory_space<vmem>>, %arg9: memref<64x64xf32, #tpu.memory_space<vmem>>, %arg10: memref<1x64xf32, #tpu.memory_space<vmem>>, %arg11: memref<4x32xf32, #tpu.memory_space<vmem>>, %arg12: memref<32x32xf32, #tpu.memory_space<vmem>>, %arg13: memref<1x32xf32, #tpu.memory_space<vmem>>, %arg14: memref<32x32xf32, #tpu.memory_space<vmem>>, %arg15: memref<1x32xf32, #tpu.memory_space<vmem>>, %arg16: memref<32x4xf32, #tpu.memory_space<vmem>>, %arg17: memref<1x4xf32, #tpu.memory_space<vmem>>, %arg18: memref<1x1x64x4xf32, #tpu.memory_space<vmem>>, %arg19: memref<192x4xf32, #tpu.memory_space<vmem>>, %arg20: memref<192x4xf32, #tpu.memory_space<vmem>>, %arg21: memref<64x32xf32, #tpu.memory_space<vmem>>) attributes {dimension_semantics = [#tpu.dimension_semantics<parallel>, #tpu.dimension_semantics<parallel>], iteration_bounds = array<i64: 2, 1>, scalar_prefetch = 0 : i64, scratch_operands = 3 : i64, tpu.core_type = #tpu.core_type<tc>, window_params = [{transform_indices = @transform_0, window_bounds = array<i64: 1, 1, 64, 4>}, {transform_indices = @transform_1, window_bounds = array<i64: 1, 24, 64>}, {pipeline_mode = #tpu.pipeline_mode<synchronous>, transform_indices = @transform_2, window_bounds = array<i64: 48, 8>}, {pipeline_mode = #tpu.pipeline_mode<synchronous>, transform_indices = @transform_3, window_bounds = array<i64: 8, 24>}, {pipeline_mode = #tpu.pipeline_mode<synchronous>, transform_indices = @transform_4, window_bounds = array<i64: 4, 64>}, {pipeline_mode = #tpu.pipeline_mode<synchronous>, transform_indices = @transform_5, window_bounds = array<i64: 4, 64>}, {pipeline_mode = #tpu.pipeline_mode<synchronous>, transform_indices = @transform_6, window_bounds = array<i64: 1, 64>}, {pipeline_mode = #tpu.pipeline_mode<synchronous>, transform_indices = @transform_7, window_bounds = array<i64: 64, 64>}, {pipeline_mode = #tpu.pipeline_mode<synchronous>, transform_indices = @transform_8, window_bounds = array<i64: 1, 64>}, {pipeline_mode = #tpu.pipeline_mode<synchronous>, transform_indices = @transform_9, window_bounds = array<i64: 4, 32>}, {pipeline_mode = #tpu.pipeline_mode<synchronous>, transform_indices = @transform_10, window_bounds = array<i64: 32, 32>}, {pipeline_mode = #tpu.pipeline_mode<synchronous>, transform_indices = @transform_11, window_bounds = array<i64: 1, 32>}, {pipeline_mode = #tpu.pipeline_mode<synchronous>, transform_indices = @transform_12, window_bounds = array<i64: 32, 32>}, {pipeline_mode = #tpu.pipeline_mode<synchronous>, transform_indices = @transform_13, window_bounds = array<i64: 1, 32>}, {pipeline_mode = #tpu.pipeline_mode<synchronous>, transform_indices = @transform_14, window_bounds = array<i64: 32, 4>}, {pipeline_mode = #tpu.pipeline_mode<synchronous>, transform_indices = @transform_15, window_bounds = array<i64: 1, 4>}, {transform_indices = @transform_16, window_bounds = array<i64: 1, 1, 64, 4>}]} {
    %c0 = arith.constant 0 : index
    %c0_0 = arith.constant 0 : index
    %c0_1 = arith.constant 0 : index
    %c0_2 = arith.constant 0 : index
    %0 = vector.load %arg2[%c0, %c0_0, %c0_1, %c0_2] : memref<1x1x64x4xf32, #tpu.memory_space<vmem>>, vector<1x1x64x4xf32>
    %1 = vector.shape_cast %0 : vector<1x1x64x4xf32> to vector<64x4xf32>
    %c0_3 = arith.constant 0 : index
    %c0_4 = arith.constant 0 : index
    %c0_5 = arith.constant 0 : index
    %2 = vector.load %arg3[%c0_3, %c0_4, %c0_5] : memref<1x24x64xf32, #tpu.memory_space<vmem>>, vector<1x24x64xf32>
    %3 = vector.shape_cast %2 : vector<1x24x64xf32> to vector<24x64xf32>
    %c0_6 = arith.constant 0 : index
    %c0_7 = arith.constant 0 : index
    %4 = vector.load %arg4[%c0_6, %c0_7] : memref<48x8xf32, #tpu.memory_space<vmem>>, vector<48x8xf32>
    %c0_8 = arith.constant 0 : index
    %c0_9 = arith.constant 0 : index
    %5 = vector.load %arg5[%c0_8, %c0_9] : memref<8x24xf32, #tpu.memory_space<vmem>>, vector<8x24xf32>
    %6 = vector.extract_strided_slice %1 {offsets = [0, 0], sizes = [8, 4], strides = [1, 1]} : vector<64x4xf32> to vector<8x4xf32>
    %cst = arith.constant dense<0.000000e+00> : vector<48x4xf32>
    %7 = tpu.matmul %4, %6, %cst {dimension_numbers = #tpu.dot_dimension_numbers<[1], [0], [0], [1], [0, 0, 1, 1], [], []>} : vector<48x8xf32>, vector<8x4xf32>, vector<48x4xf32> -> vector<48x4xf32>
    %8 = vector.extract_strided_slice %7 {offsets = [0, 0], sizes = [24, 4], strides = [1, 1]} : vector<48x4xf32> to vector<24x4xf32>
    %c0_10 = arith.constant 0 : index
    %c0_11 = arith.constant 0 : index
    %9 = vector.load %arg19[%c0_10, %c0_11] : memref<192x4xf32, #tpu.memory_space<vmem>>, vector<24x4xf32>
    tpu.vector_store %arg19[%c0_10, %c0_11], %8 {strides = array<i32>} : memref<192x4xf32, #tpu.memory_space<vmem>>, vector<24x4xf32>,
    %10 = vector.extract_strided_slice %7 {offsets = [24, 0], sizes = [24, 4], strides = [1, 1]} : vector<48x4xf32> to vector<24x4xf32>
    %c0_12 = arith.constant 0 : index
    %c0_13 = arith.constant 0 : index
    %11 = vector.load %arg20[%c0_12, %c0_13] : memref<192x4xf32, #tpu.memory_space<vmem>>, vector<24x4xf32>
    tpu.vector_store %arg20[%c0_12, %c0_13], %10 {strides = array<i32>} : memref<192x4xf32, #tpu.memory_space<vmem>>, vector<24x4xf32>,
    %12 = vector.extract_strided_slice %1 {offsets = [8, 0], sizes = [8, 4], strides = [1, 1]} : vector<64x4xf32> to vector<8x4xf32>
    %cst_14 = arith.constant dense<0.000000e+00> : vector<48x4xf32>
    %13 = tpu.matmul %4, %12, %cst_14 {dimension_numbers = #tpu.dot_dimension_numbers<[1], [0], [0], [1], [0, 0, 1, 1], [], []>} : vector<48x8xf32>, vector<8x4xf32>, vector<48x4xf32> -> vector<48x4xf32>
    %14 = vector.extract_strided_slice %13 {offsets = [0, 0], sizes = [24, 4], strides = [1, 1]} : vector<48x4xf32> to vector<24x4xf32>
    %c24 = arith.constant 24 : index
    %c0_15 = arith.constant 0 : index
    %15 = vector.load %arg19[%c24, %c0_15] : memref<192x4xf32, #tpu.memory_space<vmem>>, vector<24x4xf32>
    tpu.vector_store %arg19[%c24, %c0_15], %14 {strides = array<i32>} : memref<192x4xf32, #tpu.memory_space<vmem>>, vector<24x4xf32>,
    %16 = vector.extract_strided_slice %13 {offsets = [24, 0], sizes = [24, 4], strides = [1, 1]} : vector<48x4xf32> to vector<24x4xf32>
    %c24_16 = arith.constant 24 : index
    %c0_17 = arith.constant 0 : index
    %17 = vector.load %arg20[%c24_16, %c0_17] : memref<192x4xf32, #tpu.memory_space<vmem>>, vector<24x4xf32>
    tpu.vector_store %arg20[%c24_16, %c0_17], %16 {strides = array<i32>} : memref<192x4xf32, #tpu.memory_space<vmem>>, vector<24x4xf32>,
    %18 = vector.extract_strided_slice %1 {offsets = [16, 0], sizes = [8, 4], strides = [1, 1]} : vector<64x4xf32> to vector<8x4xf32>
    %cst_18 = arith.constant dense<0.000000e+00> : vector<48x4xf32>
    %19 = tpu.matmul %4, %18, %cst_18 {dimension_numbers = #tpu.dot_dimension_numbers<[1], [0], [0], [1], [0, 0, 1, 1], [], []>} : vector<48x8xf32>, vector<8x4xf32>, vector<48x4xf32> -> vector<48x4xf32>
    %20 = vector.extract_strided_slice %19 {offsets = [0, 0], sizes = [24, 4], strides = [1, 1]} : vector<48x4xf32> to vector<24x4xf32>
    %c48 = arith.constant 48 : index
    %c0_19 = arith.constant 0 : index
    %21 = vector.load %arg19[%c48, %c0_19] : memref<192x4xf32, #tpu.memory_space<vmem>>, vector<24x4xf32>
    tpu.vector_store %arg19[%c48, %c0_19], %20 {strides = array<i32>} : memref<192x4xf32, #tpu.memory_space<vmem>>, vector<24x4xf32>,
    %22 = vector.extract_strided_slice %19 {offsets = [24, 0], sizes = [24, 4], strides = [1, 1]} : vector<48x4xf32> to vector<24x4xf32>
    %c48_20 = arith.constant 48 : index
    %c0_21 = arith.constant 0 : index
    %23 = vector.load %arg20[%c48_20, %c0_21] : memref<192x4xf32, #tpu.memory_space<vmem>>, vector<24x4xf32>
    tpu.vector_store %arg20[%c48_20, %c0_21], %22 {strides = array<i32>} : memref<192x4xf32, #tpu.memory_space<vmem>>, vector<24x4xf32>,
    %24 = vector.extract_strided_slice %1 {offsets = [24, 0], sizes = [8, 4], strides = [1, 1]} : vector<64x4xf32> to vector<8x4xf32>
    %cst_22 = arith.constant dense<0.000000e+00> : vector<48x4xf32>
    %25 = tpu.matmul %4, %24, %cst_22 {dimension_numbers = #tpu.dot_dimension_numbers<[1], [0], [0], [1], [0, 0, 1, 1], [], []>} : vector<48x8xf32>, vector<8x4xf32>, vector<48x4xf32> -> vector<48x4xf32>
    %26 = vector.extract_strided_slice %25 {offsets = [0, 0], sizes = [24, 4], strides = [1, 1]} : vector<48x4xf32> to vector<24x4xf32>
    %c72 = arith.constant 72 : index
    %c0_23 = arith.constant 0 : index
    %27 = vector.load %arg19[%c72, %c0_23] : memref<192x4xf32, #tpu.memory_space<vmem>>, vector<24x4xf32>
    tpu.vector_store %arg19[%c72, %c0_23], %26 {strides = array<i32>} : memref<192x4xf32, #tpu.memory_space<vmem>>, vector<24x4xf32>,
    %28 = vector.extract_strided_slice %25 {offsets = [24, 0], sizes = [24, 4], strides = [1, 1]} : vector<48x4xf32> to vector<24x4xf32>
    %c72_24 = arith.constant 72 : index
    %c0_25 = arith.constant 0 : index
    %29 = vector.load %arg20[%c72_24, %c0_25] : memref<192x4xf32, #tpu.memory_space<vmem>>, vector<24x4xf32>
    tpu.vector_store %arg20[%c72_24, %c0_25], %28 {strides = array<i32>} : memref<192x4xf32, #tpu.memory_space<vmem>>, vector<24x4xf32>,
    %30 = vector.extract_strided_slice %1 {offsets = [32, 0], sizes = [8, 4], strides = [1, 1]} : vector<64x4xf32> to vector<8x4xf32>
    %cst_26 = arith.constant dense<0.000000e+00> : vector<48x4xf32>
    %31 = tpu.matmul %4, %30, %cst_26 {dimension_numbers = #tpu.dot_dimension_numbers<[1], [0], [0], [1], [0, 0, 1, 1], [], []>} : vector<48x8xf32>, vector<8x4xf32>, vector<48x4xf32> -> vector<48x4xf32>
    %32 = vector.extract_strided_slice %31 {offsets = [0, 0], sizes = [24, 4], strides = [1, 1]} : vector<48x4xf32> to vector<24x4xf32>
    %c96 = arith.constant 96 : index
    %c0_27 = arith.constant 0 : index
    %33 = vector.load %arg19[%c96, %c0_27] : memref<192x4xf32, #tpu.memory_space<vmem>>, vector<24x4xf32>
    tpu.vector_store %arg19[%c96, %c0_27], %32 {strides = array<i32>} : memref<192x4xf32, #tpu.memory_space<vmem>>, vector<24x4xf32>,
    %34 = vector.extract_strided_slice %31 {offsets = [24, 0], sizes = [24, 4], strides = [1, 1]} : vector<48x4xf32> to vector<24x4xf32>
    %c96_28 = arith.constant 96 : index
    %c0_29 = arith.constant 0 : index
    %35 = vector.load %arg20[%c96_28, %c0_29] : memref<192x4xf32, #tpu.memory_space<vmem>>, vector<24x4xf32>
    tpu.vector_store %arg20[%c96_28, %c0_29], %34 {strides = array<i32>} : memref<192x4xf32, #tpu.memory_space<vmem>>, vector<24x4xf32>,
    %36 = vector.extract_strided_slice %1 {offsets = [40, 0], sizes = [8, 4], strides = [1, 1]} : vector<64x4xf32> to vector<8x4xf32>
    %cst_30 = arith.constant dense<0.000000e+00> : vector<48x4xf32>
    %37 = tpu.matmul %4, %36, %cst_30 {dimension_numbers = #tpu.dot_dimension_numbers<[1], [0], [0], [1], [0, 0, 1, 1], [], []>} : vector<48x8xf32>, vector<8x4xf32>, vector<48x4xf32> -> vector<48x4xf32>
    %38 = vector.extract_strided_slice %37 {offsets = [0, 0], sizes = [24, 4], strides = [1, 1]} : vector<48x4xf32> to vector<24x4xf32>
    %c120 = arith.constant 120 : index
    %c0_31 = arith.constant 0 : index
    %39 = vector.load %arg19[%c120, %c0_31] : memref<192x4xf32, #tpu.memory_space<vmem>>, vector<24x4xf32>
    tpu.vector_store %arg19[%c120, %c0_31], %38 {strides = array<i32>} : memref<192x4xf32, #tpu.memory_space<vmem>>, vector<24x4xf32>,
    %40 = vector.extract_strided_slice %37 {offsets = [24, 0], sizes = [24, 4], strides = [1, 1]} : vector<48x4xf32> to vector<24x4xf32>
    %c120_32 = arith.constant 120 : index
    %c0_33 = arith.constant 0 : index
    %41 = vector.load %arg20[%c120_32, %c0_33] : memref<192x4xf32, #tpu.memory_space<vmem>>, vector<24x4xf32>
    tpu.vector_store %arg20[%c120_32, %c0_33], %40 {strides = array<i32>} : memref<192x4xf32, #tpu.memory_space<vmem>>, vector<24x4xf32>,
    %42 = vector.extract_strided_slice %1 {offsets = [48, 0], sizes = [8, 4], strides = [1, 1]} : vector<64x4xf32> to vector<8x4xf32>
    %cst_34 = arith.constant dense<0.000000e+00> : vector<48x4xf32>
    %43 = tpu.matmul %4, %42, %cst_34 {dimension_numbers = #tpu.dot_dimension_numbers<[1], [0], [0], [1], [0, 0, 1, 1], [], []>} : vector<48x8xf32>, vector<8x4xf32>, vector<48x4xf32> -> vector<48x4xf32>
    %44 = vector.extract_strided_slice %43 {offsets = [0, 0], sizes = [24, 4], strides = [1, 1]} : vector<48x4xf32> to vector<24x4xf32>
    %c144 = arith.constant 144 : index
    %c0_35 = arith.constant 0 : index
    %45 = vector.load %arg19[%c144, %c0_35] : memref<192x4xf32, #tpu.memory_space<vmem>>, vector<24x4xf32>
    tpu.vector_store %arg19[%c144, %c0_35], %44 {strides = array<i32>} : memref<192x4xf32, #tpu.memory_space<vmem>>, vector<24x4xf32>,
    %46 = vector.extract_strided_slice %43 {offsets = [24, 0], sizes = [24, 4], strides = [1, 1]} : vector<48x4xf32> to vector<24x4xf32>
    %c144_36 = arith.constant 144 : index
    %c0_37 = arith.constant 0 : index
    %47 = vector.load %arg20[%c144_36, %c0_37] : memref<192x4xf32, #tpu.memory_space<vmem>>, vector<24x4xf32>
    tpu.vector_store %arg20[%c144_36, %c0_37], %46 {strides = array<i32>} : memref<192x4xf32, #tpu.memory_space<vmem>>, vector<24x4xf32>,
    %48 = vector.extract_strided_slice %1 {offsets = [56, 0], sizes = [8, 4], strides = [1, 1]} : vector<64x4xf32> to vector<8x4xf32>
    %cst_38 = arith.constant dense<0.000000e+00> : vector<48x4xf32>
    %49 = tpu.matmul %4, %48, %cst_38 {dimension_numbers = #tpu.dot_dimension_numbers<[1], [0], [0], [1], [0, 0, 1, 1], [], []>} : vector<48x8xf32>, vector<8x4xf32>, vector<48x4xf32> -> vector<48x4xf32>
    %50 = vector.extract_strided_slice %49 {offsets = [0, 0], sizes = [24, 4], strides = [1, 1]} : vector<48x4xf32> to vector<24x4xf32>
    %c168 = arith.constant 168 : index
    %c0_39 = arith.constant 0 : index
    %51 = vector.load %arg19[%c168, %c0_39] : memref<192x4xf32, #tpu.memory_space<vmem>>, vector<24x4xf32>
    tpu.vector_store %arg19[%c168, %c0_39], %50 {strides = array<i32>} : memref<192x4xf32, #tpu.memory_space<vmem>>, vector<24x4xf32>,
    %52 = vector.extract_strided_slice %49 {offsets = [24, 0], sizes = [24, 4], strides = [1, 1]} : vector<48x4xf32> to vector<24x4xf32>
    %c168_40 = arith.constant 168 : index
    %c0_41 = arith.constant 0 : index
    %53 = vector.load %arg20[%c168_40, %c0_41] : memref<192x4xf32, #tpu.memory_space<vmem>>, vector<24x4xf32>
    tpu.vector_store %arg20[%c168_40, %c0_41], %52 {strides = array<i32>} : memref<192x4xf32, #tpu.memory_space<vmem>>, vector<24x4xf32>,
    %c0_42 = arith.constant 0 : index
    %c0_43 = arith.constant 0 : index
    %54 = vector.load %arg19[%c0_42, %c0_43] : memref<192x4xf32, #tpu.memory_space<vmem>>, vector<192x4xf32>
    %c0_44 = arith.constant 0 : index
    %c0_45 = arith.constant 0 : index
    %55 = vector.load %arg6[%c0_44, %c0_45] : memref<4x64xf32, #tpu.memory_space<vmem>>, vector<4x64xf32>
    %cst_46 = arith.constant dense<0.000000e+00> : vector<192x64xf32>
    %56 = tpu.matmul %54, %55, %cst_46 {dimension_numbers = #tpu.dot_dimension_numbers<[1], [0], [0], [1], [0, 0, 1, 1], [], []>} : vector<192x4xf32>, vector<4x64xf32>, vector<192x64xf32> -> vector<192x64xf32>
    %c0_47 = arith.constant 0 : index
    %c0_48 = arith.constant 0 : index
    %57 = vector.load %arg20[%c0_47, %c0_48] : memref<192x4xf32, #tpu.memory_space<vmem>>, vector<192x4xf32>
    %c0_49 = arith.constant 0 : index
    %c0_50 = arith.constant 0 : index
    %58 = vector.load %arg7[%c0_49, %c0_50] : memref<4x64xf32, #tpu.memory_space<vmem>>, vector<4x64xf32>
    %cst_51 = arith.constant dense<0.000000e+00> : vector<192x64xf32>
    %59 = tpu.matmul %57, %58, %cst_51 {dimension_numbers = #tpu.dot_dimension_numbers<[1], [0], [0], [1], [0, 0, 1, 1], [], []>} : vector<192x4xf32>, vector<4x64xf32>, vector<192x64xf32> -> vector<192x64xf32>
    %60 = arith.addf %56, %59 : vector<192x64xf32>
    %c0_52 = arith.constant 0 : index
    %c0_53 = arith.constant 0 : index
    %61 = vector.load %arg8[%c0_52, %c0_53] : memref<1x64xf32, #tpu.memory_space<vmem>>, vector<1x64xf32>
    %62 = vector.broadcast %61 : vector<1x64xf32> to vector<192x64xf32>
    %63 = arith.addf %60, %62 : vector<192x64xf32>
    %cst_54 = arith.constant 0.000000e+00 : f32
    %64 = vector.broadcast %cst_54 : f32 to vector<192x64xf32>
    %65 = arith.maximumf %63, %64 : vector<192x64xf32>
    %c0_55 = arith.constant 0 : index
    %c0_56 = arith.constant 0 : index
    %66 = vector.load %arg9[%c0_55, %c0_56] : memref<64x64xf32, #tpu.memory_space<vmem>>, vector<64x64xf32>
    %cst_57 = arith.constant dense<0.000000e+00> : vector<192x64xf32>
    %67 = tpu.matmul %65, %66, %cst_57 {dimension_numbers = #tpu.dot_dimension_numbers<[1], [0], [0], [1], [0, 0, 1, 1], [], []>} : vector<192x64xf32>, vector<64x64xf32>, vector<192x64xf32> -> vector<192x64xf32>
    %c0_58 = arith.constant 0 : index
    %c0_59 = arith.constant 0 : index
    %68 = vector.load %arg10[%c0_58, %c0_59] : memref<1x64xf32, #tpu.memory_space<vmem>>, vector<1x64xf32>
    %69 = vector.broadcast %68 : vector<1x64xf32> to vector<192x64xf32>
    %70 = arith.addf %67, %69 : vector<192x64xf32>
    %cst_60 = arith.constant 0.000000e+00 : f32
    %71 = vector.broadcast %cst_60 : f32 to vector<192x64xf32>
    %72 = arith.maximumf %70, %71 : vector<192x64xf32>
    %73 = vector.extract_strided_slice %72 {offsets = [0, 0], sizes = [24, 64], strides = [1, 1]} : vector<192x64xf32> to vector<24x64xf32>
    %74 = arith.mulf %73, %3 : vector<24x64xf32>
    %75 = vector.extract_strided_slice %74 {offsets = [0, 0], sizes = [24, 32], strides = [1, 1]} : vector<24x64xf32> to vector<24x32xf32>
    %76 = vector.extract_strided_slice %74 {offsets = [0, 32], sizes = [24, 32], strides = [1, 1]} : vector<24x64xf32> to vector<24x32xf32>
    %77 = arith.addf %75, %76 : vector<24x32xf32>
    %cst_61 = arith.constant dense<0.000000e+00> : vector<8x32xf32>
    %78 = tpu.matmul %5, %77, %cst_61 {dimension_numbers = #tpu.dot_dimension_numbers<[1], [0], [0], [1], [0, 0, 1, 1], [], []>} : vector<8x24xf32>, vector<24x32xf32>, vector<8x32xf32> -> vector<8x32xf32>
    %c0_62 = arith.constant 0 : index
    %c0_63 = arith.constant 0 : index
    %79 = vector.load %arg21[%c0_62, %c0_63] : memref<64x32xf32, #tpu.memory_space<vmem>>, vector<8x32xf32>
    tpu.vector_store %arg21[%c0_62, %c0_63], %78 {strides = array<i32>} : memref<64x32xf32, #tpu.memory_space<vmem>>, vector<8x32xf32>,
    %80 = vector.extract_strided_slice %72 {offsets = [24, 0], sizes = [24, 64], strides = [1, 1]} : vector<192x64xf32> to vector<24x64xf32>
    %81 = arith.mulf %80, %3 : vector<24x64xf32>
    %82 = vector.extract_strided_slice %81 {offsets = [0, 0], sizes = [24, 32], strides = [1, 1]} : vector<24x64xf32> to vector<24x32xf32>
    %83 = vector.extract_strided_slice %81 {offsets = [0, 32], sizes = [24, 32], strides = [1, 1]} : vector<24x64xf32> to vector<24x32xf32>
    %84 = arith.addf %82, %83 : vector<24x32xf32>
    %cst_64 = arith.constant dense<0.000000e+00> : vector<8x32xf32>
    %85 = tpu.matmul %5, %84, %cst_64 {dimension_numbers = #tpu.dot_dimension_numbers<[1], [0], [0], [1], [0, 0, 1, 1], [], []>} : vector<8x24xf32>, vector<24x32xf32>, vector<8x32xf32> -> vector<8x32xf32>
    %c8 = arith.constant 8 : index
    %c0_65 = arith.constant 0 : index
    %86 = vector.load %arg21[%c8, %c0_65] : memref<64x32xf32, #tpu.memory_space<vmem>>, vector<8x32xf32>
    tpu.vector_store %arg21[%c8, %c0_65], %85 {strides = array<i32>} : memref<64x32xf32, #tpu.memory_space<vmem>>, vector<8x32xf32>,
    %87 = vector.extract_strided_slice %72 {offsets = [48, 0], sizes = [24, 64], strides = [1, 1]} : vector<192x64xf32> to vector<24x64xf32>
    %88 = arith.mulf %87, %3 : vector<24x64xf32>
    %89 = vector.extract_strided_slice %88 {offsets = [0, 0], sizes = [24, 32], strides = [1, 1]} : vector<24x64xf32> to vector<24x32xf32>
    %90 = vector.extract_strided_slice %88 {offsets = [0, 32], sizes = [24, 32], strides = [1, 1]} : vector<24x64xf32> to vector<24x32xf32>
    %91 = arith.addf %89, %90 : vector<24x32xf32>
    %cst_66 = arith.constant dense<0.000000e+00> : vector<8x32xf32>
    %92 = tpu.matmul %5, %91, %cst_66 {dimension_numbers = #tpu.dot_dimension_numbers<[1], [0], [0], [1], [0, 0, 1, 1], [], []>} : vector<8x24xf32>, vector<24x32xf32>, vector<8x32xf32> -> vector<8x32xf32>
    %c16 = arith.constant 16 : index
    %c0_67 = arith.constant 0 : index
    %93 = vector.load %arg21[%c16, %c0_67] : memref<64x32xf32, #tpu.memory_space<vmem>>, vector<8x32xf32>
    tpu.vector_store %arg21[%c16, %c0_67], %92 {strides = array<i32>} : memref<64x32xf32, #tpu.memory_space<vmem>>, vector<8x32xf32>,
    %94 = vector.extract_strided_slice %72 {offsets = [72, 0], sizes = [24, 64], strides = [1, 1]} : vector<192x64xf32> to vector<24x64xf32>
    %95 = arith.mulf %94, %3 : vector<24x64xf32>
    %96 = vector.extract_strided_slice %95 {offsets = [0, 0], sizes = [24, 32], strides = [1, 1]} : vector<24x64xf32> to vector<24x32xf32>
    %97 = vector.extract_strided_slice %95 {offsets = [0, 32], sizes = [24, 32], strides = [1, 1]} : vector<24x64xf32> to vector<24x32xf32>
    %98 = arith.addf %96, %97 : vector<24x32xf32>
    %cst_68 = arith.constant dense<0.000000e+00> : vector<8x32xf32>
    %99 = tpu.matmul %5, %98, %cst_68 {dimension_numbers = #tpu.dot_dimension_numbers<[1], [0], [0], [1], [0, 0, 1, 1], [], []>} : vector<8x24xf32>, vector<24x32xf32>, vector<8x32xf32> -> vector<8x32xf32>
    %c24_69 = arith.constant 24 : index
    %c0_70 = arith.constant 0 : index
    %100 = vector.load %arg21[%c24_69, %c0_70] : memref<64x32xf32, #tpu.memory_space<vmem>>, vector<8x32xf32>
    tpu.vector_store %arg21[%c24_69, %c0_70], %99 {strides = array<i32>} : memref<64x32xf32, #tpu.memory_space<vmem>>, vector<8x32xf32>,
    %101 = vector.extract_strided_slice %72 {offsets = [96, 0], sizes = [24, 64], strides = [1, 1]} : vector<192x64xf32> to vector<24x64xf32>
    %102 = arith.mulf %101, %3 : vector<24x64xf32>
    %103 = vector.extract_strided_slice %102 {offsets = [0, 0], sizes = [24, 32], strides = [1, 1]} : vector<24x64xf32> to vector<24x32xf32>
    %104 = vector.extract_strided_slice %102 {offsets = [0, 32], sizes = [24, 32], strides = [1, 1]} : vector<24x64xf32> to vector<24x32xf32>
    %105 = arith.addf %103, %104 : vector<24x32xf32>
    %cst_71 = arith.constant dense<0.000000e+00> : vector<8x32xf32>
    %106 = tpu.matmul %5, %105, %cst_71 {dimension_numbers = #tpu.dot_dimension_numbers<[1], [0], [0], [1], [0, 0, 1, 1], [], []>} : vector<8x24xf32>, vector<24x32xf32>, vector<8x32xf32> -> vector<8x32xf32>
    %c32 = arith.constant 32 : index
    %c0_72 = arith.constant 0 : index
    %107 = vector.load %arg21[%c32, %c0_72] : memref<64x32xf32, #tpu.memory_space<vmem>>, vector<8x32xf32>
    tpu.vector_store %arg21[%c32, %c0_72], %106 {strides = array<i32>} : memref<64x32xf32, #tpu.memory_space<vmem>>, vector<8x32xf32>,
    %108 = vector.extract_strided_slice %72 {offsets = [120, 0], sizes = [24, 64], strides = [1, 1]} : vector<192x64xf32> to vector<24x64xf32>
    %109 = arith.mulf %108, %3 : vector<24x64xf32>
    %110 = vector.extract_strided_slice %109 {offsets = [0, 0], sizes = [24, 32], strides = [1, 1]} : vector<24x64xf32> to vector<24x32xf32>
    %111 = vector.extract_strided_slice %109 {offsets = [0, 32], sizes = [24, 32], strides = [1, 1]} : vector<24x64xf32> to vector<24x32xf32>
    %112 = arith.addf %110, %111 : vector<24x32xf32>
    %cst_73 = arith.constant dense<0.000000e+00> : vector<8x32xf32>
    %113 = tpu.matmul %5, %112, %cst_73 {dimension_numbers = #tpu.dot_dimension_numbers<[1], [0], [0], [1], [0, 0, 1, 1], [], []>} : vector<8x24xf32>, vector<24x32xf32>, vector<8x32xf32> -> vector<8x32xf32>
    %c40 = arith.constant 40 : index
    %c0_74 = arith.constant 0 : index
    %114 = vector.load %arg21[%c40, %c0_74] : memref<64x32xf32, #tpu.memory_space<vmem>>, vector<8x32xf32>
    tpu.vector_store %arg21[%c40, %c0_74], %113 {strides = array<i32>} : memref<64x32xf32, #tpu.memory_space<vmem>>, vector<8x32xf32>,
    %115 = vector.extract_strided_slice %72 {offsets = [144, 0], sizes = [24, 64], strides = [1, 1]} : vector<192x64xf32> to vector<24x64xf32>
    %116 = arith.mulf %115, %3 : vector<24x64xf32>
    %117 = vector.extract_strided_slice %116 {offsets = [0, 0], sizes = [24, 32], strides = [1, 1]} : vector<24x64xf32> to vector<24x32xf32>
    %118 = vector.extract_strided_slice %116 {offsets = [0, 32], sizes = [24, 32], strides = [1, 1]} : vector<24x64xf32> to vector<24x32xf32>
    %119 = arith.addf %117, %118 : vector<24x32xf32>
    %cst_75 = arith.constant dense<0.000000e+00> : vector<8x32xf32>
    %120 = tpu.matmul %5, %119, %cst_75 {dimension_numbers = #tpu.dot_dimension_numbers<[1], [0], [0], [1], [0, 0, 1, 1], [], []>} : vector<8x24xf32>, vector<24x32xf32>, vector<8x32xf32> -> vector<8x32xf32>
    %c48_76 = arith.constant 48 : index
    %c0_77 = arith.constant 0 : index
    %121 = vector.load %arg21[%c48_76, %c0_77] : memref<64x32xf32, #tpu.memory_space<vmem>>, vector<8x32xf32>
    tpu.vector_store %arg21[%c48_76, %c0_77], %120 {strides = array<i32>} : memref<64x32xf32, #tpu.memory_space<vmem>>, vector<8x32xf32>,
    %122 = vector.extract_strided_slice %72 {offsets = [168, 0], sizes = [24, 64], strides = [1, 1]} : vector<192x64xf32> to vector<24x64xf32>
    %123 = arith.mulf %122, %3 : vector<24x64xf32>
    %124 = vector.extract_strided_slice %123 {offsets = [0, 0], sizes = [24, 32], strides = [1, 1]} : vector<24x64xf32> to vector<24x32xf32>
    %125 = vector.extract_strided_slice %123 {offsets = [0, 32], sizes = [24, 32], strides = [1, 1]} : vector<24x64xf32> to vector<24x32xf32>
    %126 = arith.addf %124, %125 : vector<24x32xf32>
    %cst_78 = arith.constant dense<0.000000e+00> : vector<8x32xf32>
    %127 = tpu.matmul %5, %126, %cst_78 {dimension_numbers = #tpu.dot_dimension_numbers<[1], [0], [0], [1], [0, 0, 1, 1], [], []>} : vector<8x24xf32>, vector<24x32xf32>, vector<8x32xf32> -> vector<8x32xf32>
    %c56 = arith.constant 56 : index
    %c0_79 = arith.constant 0 : index
    %128 = vector.load %arg21[%c56, %c0_79] : memref<64x32xf32, #tpu.memory_space<vmem>>, vector<8x32xf32>
    tpu.vector_store %arg21[%c56, %c0_79], %127 {strides = array<i32>} : memref<64x32xf32, #tpu.memory_space<vmem>>, vector<8x32xf32>,
    %c0_80 = arith.constant 0 : index
    %c0_81 = arith.constant 0 : index
    %129 = vector.load %arg11[%c0_80, %c0_81] : memref<4x32xf32, #tpu.memory_space<vmem>>, vector<4x32xf32>
    %cst_82 = arith.constant dense<0.000000e+00> : vector<64x32xf32>
    %130 = tpu.matmul %1, %129, %cst_82 {dimension_numbers = #tpu.dot_dimension_numbers<[1], [0], [0], [1], [0, 0, 1, 1], [], []>} : vector<64x4xf32>, vector<4x32xf32>, vector<64x32xf32> -> vector<64x32xf32>
    %c0_83 = arith.constant 0 : index
    %c0_84 = arith.constant 0 : index
    %131 = vector.load %arg21[%c0_83, %c0_84] : memref<64x32xf32, #tpu.memory_space<vmem>>, vector<64x32xf32>
    %c0_85 = arith.constant 0 : index
    %c0_86 = arith.constant 0 : index
    %132 = vector.load %arg12[%c0_85, %c0_86] : memref<32x32xf32, #tpu.memory_space<vmem>>, vector<32x32xf32>
    %cst_87 = arith.constant dense<0.000000e+00> : vector<64x32xf32>
    %133 = tpu.matmul %131, %132, %cst_87 {dimension_numbers = #tpu.dot_dimension_numbers<[1], [0], [0], [1], [0, 0, 1, 1], [], []>} : vector<64x32xf32>, vector<32x32xf32>, vector<64x32xf32> -> vector<64x32xf32>
    %134 = arith.addf %130, %133 : vector<64x32xf32>
    %c0_88 = arith.constant 0 : index
    %c0_89 = arith.constant 0 : index
    %135 = vector.load %arg13[%c0_88, %c0_89] : memref<1x32xf32, #tpu.memory_space<vmem>>, vector<1x32xf32>
    %136 = vector.broadcast %135 : vector<1x32xf32> to vector<64x32xf32>
    %137 = arith.addf %134, %136 : vector<64x32xf32>
    %cst_90 = arith.constant 0.000000e+00 : f32
    %138 = vector.broadcast %cst_90 : f32 to vector<64x32xf32>
    %139 = arith.maximumf %137, %138 : vector<64x32xf32>
    %c0_91 = arith.constant 0 : index
    %c0_92 = arith.constant 0 : index
    %140 = vector.load %arg14[%c0_91, %c0_92] : memref<32x32xf32, #tpu.memory_space<vmem>>, vector<32x32xf32>
    %cst_93 = arith.constant dense<0.000000e+00> : vector<64x32xf32>
    %141 = tpu.matmul %139, %140, %cst_93 {dimension_numbers = #tpu.dot_dimension_numbers<[1], [0], [0], [1], [0, 0, 1, 1], [], []>} : vector<64x32xf32>, vector<32x32xf32>, vector<64x32xf32> -> vector<64x32xf32>
    %c0_94 = arith.constant 0 : index
    %c0_95 = arith.constant 0 : index
    %142 = vector.load %arg15[%c0_94, %c0_95] : memref<1x32xf32, #tpu.memory_space<vmem>>, vector<1x32xf32>
    %143 = vector.broadcast %142 : vector<1x32xf32> to vector<64x32xf32>
    %144 = arith.addf %141, %143 : vector<64x32xf32>
    %cst_96 = arith.constant 0.000000e+00 : f32
    %145 = vector.broadcast %cst_96 : f32 to vector<64x32xf32>
    %146 = arith.maximumf %144, %145 : vector<64x32xf32>
    %c0_97 = arith.constant 0 : index
    %c0_98 = arith.constant 0 : index
    %147 = vector.load %arg16[%c0_97, %c0_98] : memref<32x4xf32, #tpu.memory_space<vmem>>, vector<32x4xf32>
    %cst_99 = arith.constant dense<0.000000e+00> : vector<64x4xf32>
    %148 = tpu.matmul %146, %147, %cst_99 {dimension_numbers = #tpu.dot_dimension_numbers<[1], [0], [0], [1], [0, 0, 1, 1], [], []>} : vector<64x32xf32>, vector<32x4xf32>, vector<64x4xf32> -> vector<64x4xf32>
    %c0_100 = arith.constant 0 : index
    %c0_101 = arith.constant 0 : index
    %149 = vector.load %arg17[%c0_100, %c0_101] : memref<1x4xf32, #tpu.memory_space<vmem>>, vector<1x4xf32>
    %150 = vector.broadcast %149 : vector<1x4xf32> to vector<64x4xf32>
    %151 = arith.addf %148, %150 : vector<64x4xf32>
    %152 = arith.addf %1, %151 : vector<64x4xf32>
    %c0_102 = arith.constant 0 : index
    %c0_103 = arith.constant 0 : index
    %c0_104 = arith.constant 0 : index
    %c0_105 = arith.constant 0 : index
    %153 = vector.load %arg18[%c0_102, %c0_103, %c0_104, %c0_105] : memref<1x1x64x4xf32, #tpu.memory_space<vmem>>, vector<1x1x64x4xf32>
    %154 = vector.shape_cast %153 : vector<1x1x64x4xf32> to vector<64x4xf32>
    %155 = vector.shape_cast %152 : vector<64x4xf32> to vector<1x1x64x4xf32>
    tpu.vector_store %arg18[%c0_102, %c0_103, %c0_104, %c0_105], %155 {strides = array<i32>} : memref<1x1x64x4xf32, #tpu.memory_space<vmem>>, vector<1x1x64x4xf32>,
    return
  }
  func.func @transform_0(%arg0: i32, %arg1: i32) -> (i32, i32, i32, i32) {
    %c0_i32 = arith.constant 0 : i32
    %c0_i32_0 = arith.constant 0 : i32
    %c0_i32_1 = arith.constant 0 : i32
    return %arg0, %arg1, %c0_i32, %c0_i32_0 : i32, i32, i32, i32
  }
  func.func @transform_1(%arg0: i32, %arg1: i32) -> (i32, i32, i32) {
    %c0_i32 = arith.constant 0 : i32
    %c0_i32_0 = arith.constant 0 : i32
    %c0_i32_1 = arith.constant 0 : i32
    return %arg0, %c0_i32, %c0_i32_0 : i32, i32, i32
  }
  func.func @transform_2(%arg0: i32, %arg1: i32) -> (i32, i32) {
    %c0_i32 = arith.constant 0 : i32
    %c0_i32_0 = arith.constant 0 : i32
    %c0_i32_1 = arith.constant 0 : i32
    return %c0_i32, %c0_i32_0 : i32, i32
  }
  func.func @transform_3(%arg0: i32, %arg1: i32) -> (i32, i32) {
    %c0_i32 = arith.constant 0 : i32
    %c0_i32_0 = arith.constant 0 : i32
    %c0_i32_1 = arith.constant 0 : i32
    return %c0_i32, %c0_i32_0 : i32, i32
  }
  func.func @transform_4(%arg0: i32, %arg1: i32) -> (i32, i32) {
    %c0_i32 = arith.constant 0 : i32
    %c0_i32_0 = arith.constant 0 : i32
    %c0_i32_1 = arith.constant 0 : i32
    return %c0_i32, %c0_i32_0 : i32, i32
  }
  func.func @transform_5(%arg0: i32, %arg1: i32) -> (i32, i32) {
    %c0_i32 = arith.constant 0 : i32
    %c0_i32_0 = arith.constant 0 : i32
    %c0_i32_1 = arith.constant 0 : i32
    return %c0_i32, %c0_i32_0 : i32, i32
  }
  func.func @transform_6(%arg0: i32, %arg1: i32) -> (i32, i32) {
    %c0_i32 = arith.constant 0 : i32
    %c0_i32_0 = arith.constant 0 : i32
    %c0_i32_1 = arith.constant 0 : i32
    return %c0_i32, %c0_i32_0 : i32, i32
  }
  func.func @transform_7(%arg0: i32, %arg1: i32) -> (i32, i32) {
    %c0_i32 = arith.constant 0 : i32
    %c0_i32_0 = arith.constant 0 : i32
    %c0_i32_1 = arith.constant 0 : i32
    return %c0_i32, %c0_i32_0 : i32, i32
  }
  func.func @transform_8(%arg0: i32, %arg1: i32) -> (i32, i32) {
    %c0_i32 = arith.constant 0 : i32
    %c0_i32_0 = arith.constant 0 : i32
    %c0_i32_1 = arith.constant 0 : i32
    return %c0_i32, %c0_i32_0 : i32, i32
  }
  func.func @transform_9(%arg0: i32, %arg1: i32) -> (i32, i32) {
    %c0_i32 = arith.constant 0 : i32
    %c0_i32_0 = arith.constant 0 : i32
    %c0_i32_1 = arith.constant 0 : i32
    return %c0_i32, %c0_i32_0 : i32, i32
  }
  func.func @transform_10(%arg0: i32, %arg1: i32) -> (i32, i32) {
    %c0_i32 = arith.constant 0 : i32
    %c0_i32_0 = arith.constant 0 : i32
    %c0_i32_1 = arith.constant 0 : i32
    return %c0_i32, %c0_i32_0 : i32, i32
  }
  func.func @transform_11(%arg0: i32, %arg1: i32) -> (i32, i32) {
    %c0_i32 = arith.constant 0 : i32
    %c0_i32_0 = arith.constant 0 : i32
    %c0_i32_1 = arith.constant 0 : i32
    return %c0_i32, %c0_i32_0 : i32, i32
  }
  func.func @transform_12(%arg0: i32, %arg1: i32) -> (i32, i32) {
    %c0_i32 = arith.constant 0 : i32
    %c0_i32_0 = arith.constant 0 : i32
    %c0_i32_1 = arith.constant 0 : i32
    return %c0_i32, %c0_i32_0 : i32, i32
  }
  func.func @transform_13(%arg0: i32, %arg1: i32) -> (i32, i32) {
    %c0_i32 = arith.constant 0 : i32
    %c0_i32_0 = arith.constant 0 : i32
    %c0_i32_1 = arith.constant 0 : i32
    return %c0_i32, %c0_i32_0 : i32, i32
  }
  func.func @transform_14(%arg0: i32, %arg1: i32) -> (i32, i32) {
    %c0_i32 = arith.constant 0 : i32
    %c0_i32_0 = arith.constant 0 : i32
    %c0_i32_1 = arith.constant 0 : i32
    return %c0_i32, %c0_i32_0 : i32, i32
  }
  func.func @transform_15(%arg0: i32, %arg1: i32) -> (i32, i32) {
    %c0_i32 = arith.constant 0 : i32
    %c0_i32_0 = arith.constant 0 : i32
    %c0_i32_1 = arith.constant 0 : i32
    return %c0_i32, %c0_i32_0 : i32, i32
  }
  func.func @transform_16(%arg0: i32, %arg1: i32) -> (i32, i32, i32, i32) {
    %c0_i32 = arith.constant 0 : i32
    %c0_i32_0 = arith.constant 0 : i32
    %c0_i32_1 = arith.constant 0 : i32
    return %arg0, %arg1, %c0_i32, %c0_i32_0 : i32, i32, i32, i32
  }
}

</mosaic_0001>

<bundles_post_ra>
// kernel: mlp_decoder_forward.1
= control target key start
LH: loop header
LB: loop body
LE: loop exit
PB: predicated region body
PF: predicated region fallthrough
CT: control target
= control target key end

     0   :  { %s4774_s21 = smov 0   ;;  %s4776_s22 = smov 0   ;;  %s5481_s0 = inlined_call_operand.vmem [shape: f32[2,1,64,4], index: 0, kind: input, shape index: {}]   ;;  %s5482_s1 = inlined_call_operand.vmem [shape: f32[2,24,64], index: 1, kind: input, shape index: {}]   ;;  %s5483_s2 = inlined_call_operand.vmem [shape: f32[48,8], index: 2, kind: input, shape index: {}]   ;;  %s5484_s3 = inlined_call_operand.vmem [shape: f32[8,24], index: 3, kind: input, shape index: {}]   ;;  %s5485_s4 = inlined_call_operand.vmem [shape: f32[4,64], index: 4, kind: input, shape index: {}]   ;;  %s5486_s5 = inlined_call_operand.vmem [shape: f32[4,64], index: 5, kind: input, shape index: {}]   ;;  %s5487_s6 = inlined_call_operand.vmem [shape: f32[1,64], index: 6, kind: input, shape index: {}]   ;;  %s5488_s7 = inlined_call_operand.vmem [shape: f32[64,64], index: 7, kind: input, shape index: {}]   ;;  %s5489_s8 = inlined_call_operand.vmem [shape: f32[1,64], index: 8, kind: input, shape index: {}]   ;;  %s5490_s9 = inlined_call_operand.vmem [shape: f32[4,32], index: 9, kind: input, shape index: {}]   ;;  %s5491_s10 = inlined_call_operand.vmem [shape: f32[32,32], index: 10, kind: input, shape index: {}]   ;;  %s5492_s11 = inlined_call_operand.vmem [shape: f32[1,32], index: 11, kind: input, shape index: {}]   ;;  %s5493_s12 = inlined_call_operand.vmem [shape: f32[32,32], index: 12, kind: input, shape index: {}]   ;;  %s5494_s13 = inlined_call_operand.vmem [shape: f32[1,32], index: 13, kind: input, shape index: {}]   ;;  %s5495_s14 = inlined_call_operand.vmem [shape: f32[32,4], index: 14, kind: input, shape index: {}]   ;;  %s5496_s15 = inlined_call_operand.vmem [shape: f32[1,4], index: 15, kind: input, shape index: {}]   ;;  %s5497_s16 = inlined_call_operand.vmem [shape: f32[2,1,64,4], index: 16, kind: output, shape index: {}]  }
   0x1   :  { %5499 = sst [smem:[#allocation5_spill]] %s5481_s0  ;;  %s4778_s23 = smov 0  }
   0x2 LB: > { %s38_s24 = sadd.s32 1, %s4679_s22  ;;  %p3773_p0 = scmp.ge.s32.totalorder %s4683_s23, 1  ;;  %s4683_s23 = sphi %s4778_s23, %s26_s23   ;;  %s4679_s22 = sphi %s4776_s22, %s5503_s22   ;;  %s4675_s21 = sphi %s4774_s21, %s5502_s21  }
   0x3   : > { %p40_p1 = scmp.ge.s32.totalorder %s38_s24, 2  ;;  %p492_p2 = scmp.lt.s32.totalorder %s4683_s23, 3 }
   0x5   : > { %s5505_s24 = smov (%p40_p1, %s38_s24), 0  ;;  %p493_p3 = pnand %p3773_p0, %p492_p2 }
   0x6   : > { %p555_p4 = scmp.lt.s32.totalorder (!%p493_p3), %s4675_s21, 1  ;;  %v4795_v0 = vld [vmem:[%s5483_s2] sm:$0xff] (!%p493_p3)  ;;  %vm596_vm0 = vcmask (!%p493_p3), 64512   ;;  %s5500_s30 = sld [smem:[#allocation5_spill]] (!%p493_p3)  ;;  %v4815_v2 = vld [vmem:[%s5483_s2 + $0x8] sm:$0xff] (!%p493_p3)  ;;  %v4821_v4 = vld [vmem:[%s5483_s2 + $0x10] sm:$0xff] (!%p493_p3) }
   0x7   : > { %496 = sbr.rel (%p493_p3) target bundleno = 1794 (0x702), region = 84  ;;  %4168 = vmatprep.mubr.msk.f32.mxu0 (!%p493_p3), %vm596_vm0, %v4795_v0  ;;  %4179 = vmatprep.mubr.msk.f32.mxu1 (!%p493_p3), %vm596_vm0, %v4795_v0  ;;  %v592_v7 = vld [vmem:[%s5483_s2 + $0x18] sm:$0xff] (!%p493_p3)  ;;  %v593_v8 = vld [vmem:[%s5483_s2 + $0x20] sm:$0xff] (!%p493_p3)  ;;  %v594_v11 = vld [vmem:[%s5483_s2 + $0x28] sm:$0xff] (!%p493_p3)  ;;  %vm1546_vm1 = vcmask (!%p493_p3), 1043456   ;;  %vm710_vm2 = vcmask (!%p493_p3), 31744  }
   0x8   : > { %v1473_v14 = vld [vmem:[%s5486_s5] sm:$0xf] (!%p493_p3)  ;;  %v2051_v17 = vld [vmem:[%s5488_s7 + $0x8] sm:$0xff] (!%p493_p3)  ;;  %v2052_v18 = vld [vmem:[%s5488_s7 + $0x10] sm:$0xff] (!%p493_p3)  ;;  %vm2065_vm3 = vcmask (!%p493_p3), 523264   ;;  %vm4686_vm4 = vmmov (!%p493_p3), 0  }
   0x9   : > { %v4914_v15 = vld [vmem:[%s5485_s4] sm:$0xf] (!%p493_p3)  ;;  %v2053_v20 = vld [vmem:[%s5488_s7 + $0x18] sm:$0xff] (!%p493_p3)  ;;  %v2055_v23 = vld [vmem:[%s5488_s7 + $0x28] sm:$0xff] (!%p493_p3)  ;;  %vm2365_vm5 = vcmask (!%p493_p3), 195584   ;;  %vm2439_vm6 = vcmask (!%p493_p3), 261120  }
   0xa   : > { %v2050_v16 = vld [vmem:[%s5488_s7] sm:$0xff] (!%p493_p3)  ;;  %v4532_v21 = vpack.c.bf16 (!%p493_p3), %v2053_v20, %v2052_v18 }
   0xb   : > { %v4528_v19 = vpack.c.bf16 (!%p493_p3), %v2051_v17, %v2050_v16  ;;  %v2054_v22 = vld [vmem:[%s5488_s7 + $0x20] sm:$0xff] (!%p493_p3) }
   0xc   : > { %v4536_v24 = vpack.c.bf16 (!%p493_p3), %v2055_v23, %v2054_v22 }
   0xe   : > { %s5507_s21 = smov (!%p555_p4, %s4675_s21), 1 }
   0xf   : > { %s5498_s27 = sshll.u32 %s5507_s21, 6  ;;  %s4624_s20 = smul.u32 24, %s5507_s21 }
  0x10   : > { %s4809_s0 = scalar_lea.vmem %s5500_s30, %s5498_s27  ;;  %s4688_s30 = smov 96  }
  0x11   : > { %v578_v1 = vld [vmem:[%s4809_s0] sm:$0xff]  ;;  %v579_v3 = vld [vmem:[%s4809_s0 + $0x8] sm:$0xff]  ;;  %v580_v5 = vld [vmem:[%s4809_s0 + $0x10] sm:$0xff]  ;;  %s568_s29 = scalar_lea.vmem %s5482_s1, %s4624_s20  ;;  %s5501_s19 = sshll.u32 %s5507_s21, 6 }
  0x12   : > { %4166 = vmatprep.subr.mxu0 %v578_v1  ;;  %4177 = vmatprep.subr.mxu1 %v579_v3  ;;  %v581_v6 = vld [vmem:[%s4809_s0 + $0x18] sm:$0xff]  ;;  %v582_v9 = vld [vmem:[%s4809_s0 + $0x20] sm:$0xff]  ;;  %v583_v10 = vld [vmem:[%s4809_s0 + $0x28] sm:$0xff]  ;;  %s577_s26 = scalar_lea.vmem %s5497_s16, %s5501_s19 }
  0x13   : > { %4167 = vmatpush3.msra.mxu0 %v578_v1  ;;  %4178 = vmatpush3.msra.mxu1 %v579_v3  ;;  %v584_v12 = vld [vmem:[%s4809_s0 + $0x30] sm:$0xff]  ;;  %v585_v13 = vld [vmem:[%s4809_s0 + $0x38] sm:$0xff] }
  0x14   : > { %4169 = vmatmul.mubr.msk.f32.vlgmr.msra.gmra.mrb[0].mxu0 %vm596_vm0, %v4815_v2  ;;  %4180 = vmatmul.mubr.msk.f32.vlgmr.msra.gmra.mrb[0].mxu1 %vm596_vm0, %v4815_v2 }
  0x15   : > { %4171 = vmatprep.mubr.msk.f32.mxu0 %vm596_vm0, %v4821_v4  ;;  %4182 = vmatprep.mubr.msk.f32.mxu1 %vm596_vm0, %v4821_v4 }
  0x16   : > { %4188 = vmatprep.subr.mxu0 %v580_v5  ;;  %4199 = vmatprep.subr.mxu1 %v581_v6 }
  0x17   : > { %4189 = vmatpush3.msra.mxu0 %v580_v5  ;;  %4200 = vmatpush3.msra.mxu1 %v581_v6 }
  0x18   : > { %4172 = vmatmul.mubr.msk.f32.gmra.mrb[2].mxu0 %vm596_vm0, %v592_v7  ;;  %4183 = vmatmul.mubr.msk.f32.gmra.mrb[2].mxu1 %vm596_vm0, %v592_v7 }
  0x19   : > { %4174 = vmatprep.mubr.msk.f32.mxu0 %vm596_vm0, %v593_v8  ;;  %4185 = vmatprep.mubr.msk.f32.mxu1 %vm596_vm0, %v593_v8 }
  0x1a   : > { %4210 = vmatprep.subr.mxu0 %v582_v9  ;;  %4221 = vmatprep.subr.mxu1 %v583_v10 }
  0x1c   : > { %4175 = vmatmul.mubr.msk.f32.gmra.mrb[4].mxu0 %vm596_vm0, %v594_v11  ;;  %4186 = vmatmul.mubr.msk.f32.gmra.mrb[4].mxu1 %vm596_vm0, %v594_v11 }
  0x1d   : > { %4190 = vmatprep.mubr.msk.f32.mxu0 %vm596_vm0, %v4795_v0  ;;  %4201 = vmatprep.mubr.msk.f32.mxu1 %vm596_vm0, %v4795_v0 }
  0x20   : > { %4191 = vmatmul.mubr.msk.f32.vlgmr.msra.gmra.mrb[6].mxu0 %vm596_vm0, %v4815_v2  ;;  %4202 = vmatmul.mubr.msk.f32.vlgmr.msra.gmra.mrb[6].mxu1 %vm596_vm0, %v4815_v2 }
  0x21   : > { %4193 = vmatprep.mubr.msk.f32.mxu0 %vm596_vm0, %v4821_v4  ;;  %4204 = vmatprep.mubr.msk.f32.mxu1 %vm596_vm0, %v4821_v4 }
  0x22   : > { %4211 = vmatpush3.msra.mxu0 %v582_v9  ;;  %4222 = vmatpush3.msra.mxu1 %v583_v10 }
  0x23   : > { %4232 = vmatprep.subr.mxu0 %v584_v12  ;;  %4243 = vmatprep.subr.mxu1 %v585_v13 }
  0x24   : > { %4194 = vmatmul.mubr.msk.f32.gmra.mrb[8].mxu0 %vm596_vm0, %v592_v7  ;;  %4205 = vmatmul.mubr.msk.f32.gmra.mrb[8].mxu1 %vm596_vm0, %v592_v7 }
  0x25   : > { %4196 = vmatprep.mubr.msk.f32.mxu0 %vm596_vm0, %v593_v8  ;;  %4207 = vmatprep.mubr.msk.f32.mxu1 %vm596_vm0, %v593_v8 }
  0x28   : > { %4197 = vmatmul.mubr.msk.f32.gmra.mrb[10].mxu0 %vm596_vm0, %v594_v11  ;;  %4208 = vmatmul.mubr.msk.f32.gmra.mrb[10].mxu1 %vm596_vm0, %v594_v11 }
  0x29   : > { %4212 = vmatprep.mubr.msk.f32.mxu0 %vm596_vm0, %v4795_v0  ;;  %4223 = vmatprep.mubr.msk.f32.mxu1 %vm596_vm0, %v4795_v0 }
  0x2c   : > { %4213 = vmatmul.mubr.msk.f32.vlgmr.msra.gmra.mrb[12].mxu0 %vm596_vm0, %v4815_v2  ;;  %4224 = vmatmul.mubr.msk.f32.vlgmr.msra.gmra.mrb[12].mxu1 %vm596_vm0, %v4815_v2 }
  0x2d   : > { %4215 = vmatprep.mubr.msk.f32.mxu0 %vm596_vm0, %v4821_v4  ;;  %4226 = vmatprep.mubr.msk.f32.mxu1 %vm596_vm0, %v4821_v4 }
  0x2e   : > { %4233 = vmatpush3.msra.mxu0 %v584_v12  ;;  %4244 = vmatpush3.msra.mxu1 %v585_v13 }
  0x2f   : > { %4254 = vmatprep.subr.msk.mxu0 %vm1546_vm1, %v1473_v14  ;;  %4529 = vmatprep.subr.bf16.mxu1 %v4528_v19 }
  0x30   : > { %4216 = vmatmul.mubr.msk.f32.gmra.mrb[14].mxu0 %vm596_vm0, %v592_v7  ;;  %4227 = vmatmul.mubr.msk.f32.gmra.mrb[14].mxu1 %vm596_vm0, %v592_v7 }
  0x31   : > { %4218 = vmatprep.mubr.msk.f32.mxu0 %vm596_vm0, %v593_v8  ;;  %4229 = vmatprep.mubr.msk.f32.mxu1 %vm596_vm0, %v593_v8 }
  0x34   : > { %4219 = vmatmul.mubr.msk.f32.gmra.mrb[16].mxu0 %vm596_vm0, %v594_v11  ;;  %4230 = vmatmul.mubr.msk.f32.gmra.mrb[16].mxu1 %vm596_vm0, %v594_v11 }
  0x35   : > { %4234 = vmatprep.mubr.msk.f32.mxu0 %vm596_vm0, %v4795_v0  ;;  %4245 = vmatprep.mubr.msk.f32.mxu1 %vm596_vm0, %v4795_v0 }
  0x38   : > { %4235 = vmatmul.mubr.msk.f32.vlgmr.msra.gmra.mrb[18].mxu0 %vm596_vm0, %v4815_v2  ;;  %4246 = vmatmul.mubr.msk.f32.vlgmr.msra.gmra.mrb[18].mxu1 %vm596_vm0, %v4815_v2 }
  0x39   : > { %4237 = vmatprep.mubr.msk.f32.mxu0 %vm596_vm0, %v4821_v4  ;;  %4248 = vmatprep.mubr.msk.f32.mxu1 %vm596_vm0, %v4821_v4 }
  0x3a   : > { %4255 = vmatpush3.msk.msra.mxu0 %vm1546_vm1, %v1473_v14  ;;  %4531 = vmatpush3.bf16.msra.mxu1 %v4528_v19 }
  0x3b   : > { %4292 = vmatprep.subr.msk.mxu0 %vm1546_vm1, %v4914_v15  ;;  %4533 = vmatprep.subr.bf16.mxu1 %v4532_v21 }
  0x3c   : > { %4238 = vmatmul.mubr.msk.f32.gmra.mrb[20].mxu0 %vm596_vm0, %v592_v7  ;;  %4249 = vmatmul.mubr.msk.f32.gmra.mrb[20].mxu1 %vm596_vm0, %v592_v7 }
  0x3d   : > { %4240 = vmatprep.mubr.msk.f32.mxu0 %vm596_vm0, %v593_v8  ;;  %4251 = vmatprep.mubr.msk.f32.mxu1 %vm596_vm0, %v593_v8 }
  0x3e   : > { %4535 = vmatpush3.bf16.msra.mxu1 %v4532_v21 }
  0x3f   : > { %4537 = vmatprep.subr.bf16.mxu1 %v4536_v24 }
  0x40   : > { %4241 = vmatmul.mubr.msk.f32.gmra.mrb[22].mxu0 %vm596_vm0, %v594_v11  ;;  %4252 = vmatmul.mubr.msk.f32.gmra.mrb[22].mxu1 %vm596_vm0, %v594_v11 }
  0x42   : > { %4539 = vmatpush3.bf16.msra.mxu1 %v4536_v24 }
  0xe7   : > { %v4170_v25 = vpop.f32.mrb[0].mxu0  ;;  %v4181_v26 = vpop.f32.mrb[0].mxu1 }
  0xe8   : > { %712 = vst.msk [vmem:[#allocation2 + $0x8] sm:$0xff] %vm710_vm2, %v4170_v25  ;;  %v681_v27 = vpop.f32.mrb[1].mxu0  ;;  %813 = vst.msk [vmem:[#allocation2 + $0x20] sm:$0xff] %vm710_vm2, %v4181_v26  ;;  %v783_v28 = vpop.f32.mrb[1].mxu1 }
  0xe9   : > { %711 = vst.msk [vmem:[#allocation2] sm:$0xff] %vm710_vm2, %v681_v27  ;;  %812 = vst.msk [vmem:[#allocation2 + $0x18] sm:$0xff] %vm710_vm2, %v783_v28 }
  0xeb   : > { %v4173_v29 = vpop.f32.mrb[2].mxu0  ;;  %v4184_v30 = vpop.f32.mrb[2].mxu1 }
  0xec   : > { %714 = vst.msk [vmem:[#allocation3] sm:$0xff] %vm710_vm2, %v4173_v29  ;;  %v691_v31 = vpop.f32.mrb[3].mxu0  ;;  %815 = vst.msk [vmem:[#allocation3 + $0x18] sm:$0xff] %vm710_vm2, %v4184_v30  ;;  %v793_v32 = vpop.f32.mrb[3].mxu1 }
  0xed   : > { %713 = vst.msk [vmem:[#allocation2 + $0x10] sm:$0xff] %vm710_vm2, %v691_v31  ;;  %814 = vst.msk [vmem:[#allocation2 + $0x28] sm:$0xff] %vm710_vm2, %v793_v32 }
  0xef   : > { %v4176_v33 = vpop.f32.mrb[4].mxu0  ;;  %v4187_v34 = vpop.f32.mrb[4].mxu1 }
  0xf0   : > { %716 = vst.msk [vmem:[#allocation3 + $0x10] sm:$0xff] %vm710_vm2, %v4176_v33  ;;  %v701_v35 = vpop.f32.mrb[5].mxu0  ;;  %817 = vst.msk [vmem:[#allocation3 + $0x28] sm:$0xff] %vm710_vm2, %v4187_v34  ;;  %v803_v36 = vpop.f32.mrb[5].mxu1  ;;  %v1424_v33 = vld [vmem:[#allocation2] sm:$0xff]  ;;  %v1425_v34 = vld [vmem:[#allocation2 + $0x8] sm:$0xff] }
  0xf1   : > { %715 = vst.msk [vmem:[#allocation3 + $0x8] sm:$0xff] %vm710_vm2, %v701_v35  ;;  %816 = vst.msk [vmem:[#allocation3 + $0x20] sm:$0xff] %vm710_vm2, %v803_v36  ;;  %v1427_v36 = vld [vmem:[#allocation2 + $0x18] sm:$0xff] }
  0xf3   : > { %v4192_v37 = vpop.f32.mrb[6].mxu0  ;;  %v1449_v38 = vld [vmem:[#allocation3] sm:$0xff]  ;;  %v4203_v39 = vpop.f32.mrb[6].mxu1  ;;  %v1452_v52 = vld [vmem:[#allocation3 + $0x18] sm:$0xff] }
  0xf4   : > { %914 = vst.msk [vmem:[#allocation2 + $0x38] sm:$0xff] %vm710_vm2, %v4192_v37  ;;  %v884_v40 = vpop.f32.mrb[7].mxu0  ;;  %4256 = vmatprep.mubr.msk.f32.mxu0 %vm710_vm2, %v1449_v38  ;;  %1015 = vst.msk [vmem:[#allocation2 + $0x50] sm:$0xff] %vm710_vm2, %v4203_v39  ;;  %v985_v41 = vpop.f32.mrb[7].mxu1  ;;  %v1426_v35 = vld [vmem:[#allocation2 + $0x10] sm:$0xff]  ;;  %v1428_v37 = vld [vmem:[#allocation2 + $0x20] sm:$0xff] }
  0xf5   : > { %913 = vst.msk [vmem:[#allocation2 + $0x30] sm:$0xff] %vm710_vm2, %v884_v40  ;;  %1014 = vst.msk [vmem:[#allocation2 + $0x48] sm:$0xff] %vm710_vm2, %v985_v41  ;;  %v1429_v38 = vld [vmem:[#allocation2 + $0x28] sm:$0xff] }
  0xf7   : > { %v4195_v42 = vpop.f32.mrb[8].mxu0  ;;  %v4206_v43 = vpop.f32.mrb[8].mxu1  ;;  %v1451_v47 = vld [vmem:[#allocation3 + $0x10] sm:$0xff]  ;;  %v1454_v57 = vld [vmem:[#allocation3 + $0x28] sm:$0xff] }
  0xf8   : > { %916 = vst.msk [vmem:[#allocation3 + $0x30] sm:$0xff] %vm710_vm2, %v4195_v42  ;;  %v894_v44 = vpop.f32.mrb[9].mxu0  ;;  %v1450_v45 = vld [vmem:[#allocation3 + $0x8] sm:$0xff]  ;;  %1017 = vst.msk [vmem:[#allocation3 + $0x48] sm:$0xff] %vm710_vm2, %v4206_v43  ;;  %v995_v46 = vpop.f32.mrb[9].mxu1  ;;  %v1453_v49 = vld [vmem:[#allocation3 + $0x20] sm:$0xff] }
  0xf9   : > { %915 = vst.msk [vmem:[#allocation2 + $0x40] sm:$0xff] %vm710_vm2, %v894_v44  ;;  %4257 = vmatmul.mubr.msk.f32.vlgmr.msra.gmra.mrb[24].mxu0 %vm710_vm2, %v1450_v45  ;;  %1016 = vst.msk [vmem:[#allocation2 + $0x58] sm:$0xff] %vm710_vm2, %v995_v46 }
  0xfa   : > { %4259 = vmatprep.mubr.msk.f32.mxu0 %vm710_vm2, %v1451_v47  ;;  %4293 = vmatpush3.msk.msra.mxu0 %vm1546_vm1, %v4914_v15 }
  0xfb   : > { %v4198_v48 = vpop.f32.mrb[10].mxu0  ;;  %v4209_v50 = vpop.f32.mrb[10].mxu1  ;;  %v1431_v40 = vld [vmem:[#allocation2 + $0x38] sm:$0xff]  ;;  %v1434_v43 = vld [vmem:[#allocation2 + $0x50] sm:$0xff] }
  0xfc   : > { %918 = vst.msk [vmem:[#allocation3 + $0x40] sm:$0xff] %vm710_vm2, %v4198_v48  ;;  %v904_v51 = vpop.f32.mrb[11].mxu0  ;;  %1019 = vst.msk [vmem:[#allocation3 + $0x58] sm:$0xff] %vm710_vm2, %v4209_v50  ;;  %v1005_v53 = vpop.f32.mrb[11].mxu1  ;;  %v1430_v39 = vld [vmem:[#allocation2 + $0x30] sm:$0xff]  ;;  %v1433_v42 = vld [vmem:[#allocation2 + $0x48] sm:$0xff] }
  0xfd   : > { %917 = vst.msk [vmem:[#allocation3 + $0x38] sm:$0xff] %vm710_vm2, %v904_v51  ;;  %4260 = vmatmul.mubr.msk.f32.gmra.mrb[26].mxu0 %vm710_vm2, %v1452_v52  ;;  %1018 = vst.msk [vmem:[#allocation3 + $0x50] sm:$0xff] %vm710_vm2, %v1005_v53 }
  0xfe   : > { %4262 = vmatprep.mubr.msk.f32.mxu0 %vm710_vm2, %v1453_v49 }
  0xff   : > { %v4214_v54 = vpop.f32.mrb[12].mxu0  ;;  %v4225_v55 = vpop.f32.mrb[12].mxu1  ;;  %v1455_v59 = vld [vmem:[#allocation3 + $0x30] sm:$0xff]  ;;  %v1458_v6 = vld [vmem:[#allocation3 + $0x48] sm:$0xff] }
 0x100   : > { %1116 = vst.msk [vmem:[#allocation2 + $0x68] sm:$0xff] %vm710_vm2, %v4214_v54  ;;  %v1086_v56 = vpop.f32.mrb[13].mxu0  ;;  %1217 = vst.msk [vmem:[#allocation2 + $0x80] sm:$0xff] %vm710_vm2, %v4225_v55  ;;  %v1187_v58 = vpop.f32.mrb[13].mxu1  ;;  %v1432_v41 = vld [vmem:[#allocation2 + $0x40] sm:$0xff]  ;;  %v1435_v44 = vld [vmem:[#allocation2 + $0x58] sm:$0xff] }
 0x101   : > { %1115 = vst.msk [vmem:[#allocation2 + $0x60] sm:$0xff] %vm710_vm2, %v1086_v56  ;;  %4263 = vmatmul.mubr.msk.f32.gmra.mrb[28].mxu0 %vm710_vm2, %v1454_v57  ;;  %1216 = vst.msk [vmem:[#allocation2 + $0x78] sm:$0xff] %vm710_vm2, %v1187_v58  ;;  %v2056_v57 = vld [vmem:[%s5488_s7 + $0x30] sm:$0xff]  ;;  %v2057_v58 = vld [vmem:[%s5488_s7 + $0x38] sm:$0xff] }
 0x102   : > { %4265 = vmatprep.mubr.msk.f32.mxu0 %vm710_vm2, %v1455_v59  ;;  %v4540_v59 = vpack.c.bf16 %v2057_v58, %v2056_v57 }
 0x103   : > { %v4217_v60 = vpop.f32.mrb[14].mxu0  ;;  %v4228_v61 = vpop.f32.mrb[14].mxu1  ;;  %v1457_v1 = vld [vmem:[#allocation3 + $0x40] sm:$0xff]  ;;  %v1460_v11 = vld [vmem:[#allocation3 + $0x58] sm:$0xff] }
 0x104   : > { %1118 = vst.msk [vmem:[#allocation3 + $0x60] sm:$0xff] %vm710_vm2, %v4217_v60  ;;  %v1096_v62 = vpop.f32.mrb[15].mxu0  ;;  %v1456_v63 = vld [vmem:[#allocation3 + $0x38] sm:$0xff]  ;;  %1219 = vst.msk [vmem:[#allocation3 + $0x78] sm:$0xff] %vm710_vm2, %v4228_v61  ;;  %v1197_v0 = vpop.f32.mrb[15].mxu1  ;;  %v1459_v3 = vld [vmem:[#allocation3 + $0x50] sm:$0xff]  ;;  %4541 = vmatprep.subr.bf16.mxu1 %v4540_v59 }
 0x105   : > { %1117 = vst.msk [vmem:[#allocation2 + $0x70] sm:$0xff] %vm710_vm2, %v1096_v62  ;;  %4266 = vmatmul.mubr.msk.f32.gmra.mrb[30].mxu0 %vm710_vm2, %v1456_v63  ;;  %1218 = vst.msk [vmem:[#allocation2 + $0x88] sm:$0xff] %vm710_vm2, %v1197_v0  ;;  %4543 = vmatpush3.bf16.msra.mxu1 %v4540_v59  ;;  %v5043_v60 = vld [vmem:[%s5487_s6] ss:$0 sm:$0xff] }
 0x106   : > { %4268 = vmatprep.mubr.msk.f32.mxu0 %vm710_vm2, %v1457_v1 }
 0x107   : > { %v4220_v2 = vpop.f32.mrb[16].mxu0  ;;  %v4231_v4 = vpop.f32.mrb[16].mxu1  ;;  %v1437_v46 = vld [vmem:[#allocation2 + $0x68] sm:$0xff]  ;;  %v1440_v49 = vld [vmem:[#allocation2 + $0x80] sm:$0xff] }
 0x108   : > { %1120 = vst.msk [vmem:[#allocation3 + $0x70] sm:$0xff] %vm710_vm2, %v4220_v2  ;;  %v1106_v5 = vpop.f32.mrb[17].mxu0  ;;  %1221 = vst.msk [vmem:[#allocation3 + $0x88] sm:$0xff] %vm710_vm2, %v4231_v4  ;;  %v1207_v7 = vpop.f32.mrb[17].mxu1  ;;  %v1436_v45 = vld [vmem:[#allocation2 + $0x60] sm:$0xff]  ;;  %v1439_v48 = vld [vmem:[#allocation2 + $0x78] sm:$0xff] }
 0x109   : > { %1119 = vst.msk [vmem:[#allocation3 + $0x68] sm:$0xff] %vm710_vm2, %v1106_v5  ;;  %4269 = vmatmul.mubr.msk.f32.gmra.mrb[32].mxu0 %vm710_vm2, %v1458_v6  ;;  %1220 = vst.msk [vmem:[#allocation3 + $0x80] sm:$0xff] %vm710_vm2, %v1207_v7 }
 0x10a   : > { %4271 = vmatprep.mubr.msk.f32.mxu0 %vm710_vm2, %v1459_v3 }
 0x10b   : > { %v4236_v8 = vpop.f32.mrb[18].mxu0  ;;  %v4247_v9 = vpop.f32.mrb[18].mxu1  ;;  %v1461_v13 = vld [vmem:[#allocation3 + $0x60] sm:$0xff]  ;;  %v1464_v24 = vld [vmem:[#allocation3 + $0x78] sm:$0xff] }
 0x10c   : > { %1318 = vst.msk [vmem:[#allocation2 + $0x98] sm:$0xff] %vm710_vm2, %v4236_v8  ;;  %v1288_v10 = vpop.f32.mrb[19].mxu0  ;;  %1419 = vst.msk [vmem:[#allocation2 + $0xb0] sm:$0xff] %vm710_vm2, %v4247_v9  ;;  %v1389_v12 = vpop.f32.mrb[19].mxu1  ;;  %v1438_v47 = vld [vmem:[#allocation2 + $0x70] sm:$0xff]  ;;  %v1441_v50 = vld [vmem:[#allocation2 + $0x88] sm:$0xff] }
 0x10d   : > { %1317 = vst.msk [vmem:[#allocation2 + $0x90] sm:$0xff] %vm710_vm2, %v1288_v10  ;;  %4272 = vmatmul.mubr.msk.f32.gmra.mrb[34].mxu0 %vm710_vm2, %v1460_v11  ;;  %1418 = vst.msk [vmem:[#allocation2 + $0xa8] sm:$0xff] %vm710_vm2, %v1389_v12 }
 0x10e   : > { %4274 = vmatprep.mubr.msk.f32.mxu0 %vm710_vm2, %v1461_v13 }
 0x10f   : > { %v4239_v14 = vpop.f32.mrb[20].mxu0  ;;  %v4250_v15 = vpop.f32.mrb[20].mxu1  ;;  %v1463_v19 = vld [vmem:[#allocation3 + $0x70] sm:$0xff]  ;;  %v1466_v26 = vld [vmem:[#allocation3 + $0x88] sm:$0xff] }
 0x110   : > { %1320 = vst.msk [vmem:[#allocation3 + $0x90] sm:$0xff] %vm710_vm2, %v4239_v14  ;;  %v1298_v16 = vpop.f32.mrb[21].mxu0  ;;  %v1462_v17 = vld [vmem:[#allocation3 + $0x68] sm:$0xff]  ;;  %1421 = vst.msk [vmem:[#allocation3 + $0xa8] sm:$0xff] %vm710_vm2, %v4250_v15  ;;  %v1399_v18 = vpop.f32.mrb[21].mxu1  ;;  %v1465_v21 = vld [vmem:[#allocation3 + $0x80] sm:$0xff] }
 0x111   : > { %1319 = vst.msk [vmem:[#allocation2 + $0xa0] sm:$0xff] %vm710_vm2, %v1298_v16  ;;  %4275 = vmatmul.mubr.msk.f32.gmra.mrb[36].mxu0 %vm710_vm2, %v1462_v17  ;;  %1420 = vst.msk [vmem:[#allocation2 + $0xb8] sm:$0xff] %vm710_vm2, %v1399_v18 }
 0x112   : > { %4277 = vmatprep.mubr.msk.f32.mxu0 %vm710_vm2, %v1463_v19 }
 0x113   : > { %v4242_v20 = vpop.f32.mrb[22].mxu0  ;;  %v4253_v22 = vpop.f32.mrb[22].mxu1  ;;  %v1443_v52 = vld [vmem:[#allocation2 + $0x98] sm:$0xff]  ;;  %v1446_v55 = vld [vmem:[#allocation2 + $0xb0] sm:$0xff] }
 0x114   : > { %1322 = vst.msk [vmem:[#allocation3 + $0xa0] sm:$0xff] %vm710_vm2, %v4242_v20  ;;  %v1308_v23 = vpop.f32.mrb[23].mxu0  ;;  %1423 = vst.msk [vmem:[#allocation3 + $0xb8] sm:$0xff] %vm710_vm2, %v4253_v22  ;;  %v1409_v25 = vpop.f32.mrb[23].mxu1  ;;  %v1442_v51 = vld [vmem:[#allocation2 + $0x90] sm:$0xff]  ;;  %v1445_v54 = vld [vmem:[#allocation2 + $0xa8] sm:$0xff] }
 0x115   : > { %1321 = vst.msk [vmem:[#allocation3 + $0x98] sm:$0xff] %vm710_vm2, %v1308_v23  ;;  %4278 = vmatmul.mubr.msk.f32.gmra.mrb[38].mxu0 %vm710_vm2, %v1464_v24  ;;  %1422 = vst.msk [vmem:[#allocation3 + $0xb0] sm:$0xff] %vm710_vm2, %v1409_v25 }
 0x116   : > { %4280 = vmatprep.mubr.msk.f32.mxu0 %vm710_vm2, %v1465_v21 }
 0x117   : > { %v1467_v27 = vld [vmem:[#allocation3 + $0x90] sm:$0xff]  ;;  %v1470_v31 = vld [vmem:[#allocation3 + $0xa8] sm:$0xff] }
 0x118   : > { %v1444_v53 = vld [vmem:[#allocation2 + $0xa0] sm:$0xff]  ;;  %v1447_v56 = vld [vmem:[#allocation2 + $0xb8] sm:$0xff] }
 0x119   : > { %4281 = vmatmul.mubr.msk.f32.gmra.mrb[40].mxu0 %vm710_vm2, %v1466_v26 }
 0x11a   : > { %4283 = vmatprep.mubr.msk.f32.mxu0 %vm710_vm2, %v1467_v27 }
 0x11b   : > { %v1469_v29 = vld [vmem:[#allocation3 + $0xa0] sm:$0xff]  ;;  %v1472_v32 = vld [vmem:[#allocation3 + $0xb8] sm:$0xff] }
 0x11c   : > { %v1468_v28 = vld [vmem:[#allocation3 + $0x98] sm:$0xff]  ;;  %v1471_v30 = vld [vmem:[#allocation3 + $0xb0] sm:$0xff] }
 0x11d   : > { %4284 = vmatmul.mubr.msk.f32.gmra.mrb[42].mxu0 %vm710_vm2, %v1468_v28 }
 0x11e   : > { %4286 = vmatprep.mubr.msk.f32.mxu0 %vm710_vm2, %v1469_v29 }
 0x121   : > { %4287 = vmatmul.mubr.msk.f32.gmra.mrb[44].mxu0 %vm710_vm2, %v1470_v31 }
 0x122   : > { %4289 = vmatprep.mubr.msk.f32.mxu0 %vm710_vm2, %v1471_v30 }
 0x125   : > { %4290 = vmatmul.mubr.msk.f32.gmra.mrb[46].mxu0 %vm710_vm2, %v1472_v32 }
 0x126   : > { %4294 = vmatprep.mubr.msk.f32.mxu0 %vm710_vm2, %v1424_v33 }
 0x129   : > { %4295 = vmatmul.mubr.msk.f32.vlgmr.msra.gmra.mrb[24].mxu0 %vm710_vm2, %v1425_v34 }
 0x12a   : > { %4297 = vmatprep.mubr.msk.f32.mxu0 %vm710_vm2, %v1426_v35 }
 0x12d   : > { %4298 = vmatmul.mubr.msk.f32.gmra.mrb[26].mxu0 %vm710_vm2, %v1427_v36 }
 0x12e   : > { %4300 = vmatprep.mubr.msk.f32.mxu0 %vm710_vm2, %v1428_v37 }
 0x131   : > { %4301 = vmatmul.mubr.msk.f32.gmra.mrb[28].mxu0 %vm710_vm2, %v1429_v38 }
 0x132   : > { %4303 = vmatprep.mubr.msk.f32.mxu0 %vm710_vm2, %v1430_v39 }
 0x135   : > { %4304 = vmatmul.mubr.msk.f32.gmra.mrb[30].mxu0 %vm710_vm2, %v1431_v40 }
 0x136   : > { %4306 = vmatprep.mubr.msk.f32.mxu0 %vm710_vm2, %v1432_v41 }
 0x139   : > { %4307 = vmatmul.mubr.msk.f32.gmra.mrb[32].mxu0 %vm710_vm2, %v1433_v42 }
 0x13a   : > { %4309 = vmatprep.mubr.msk.f32.mxu0 %vm710_vm2, %v1434_v43 }
 0x13d   : > { %4310 = vmatmul.mubr.msk.f32.gmra.mrb[34].mxu0 %vm710_vm2, %v1435_v44 }
 0x13e   : > { %4312 = vmatprep.mubr.msk.f32.mxu0 %vm710_vm2, %v1436_v45 }
 0x141   : > { %4313 = vmatmul.mubr.msk.f32.gmra.mrb[36].mxu0 %vm710_vm2, %v1437_v46 }
 0x142   : > { %4315 = vmatprep.mubr.msk.f32.mxu0 %vm710_vm2, %v1438_v47 }
 0x145   : > { %4316 = vmatmul.mubr.msk.f32.gmra.mrb[38].mxu0 %vm710_vm2, %v1439_v48 }
 0x146   : > { %4318 = vmatprep.mubr.msk.f32.mxu0 %vm710_vm2, %v1440_v49 }
 0x149   : > { %4319 = vmatmul.mubr.msk.f32.gmra.mrb[40].mxu0 %vm710_vm2, %v1441_v50 }
 0x14a   : > { %4321 = vmatprep.mubr.msk.f32.mxu0 %vm710_vm2, %v1442_v51 }
 0x14d   : > { %4322 = vmatmul.mubr.msk.f32.gmra.mrb[42].mxu0 %vm710_vm2, %v1443_v52 }
 0x14e   : > { %4324 = vmatprep.mubr.msk.f32.mxu0 %vm710_vm2, %v1444_v53 }
 0x151   : > { %4325 = vmatmul.mubr.msk.f32.gmra.mrb[44].mxu0 %vm710_vm2, %v1445_v54 }
 0x152   : > { %4327 = vmatprep.mubr.msk.f32.mxu0 %vm710_vm2, %v1446_v55 }
 0x155   : > { %4328 = vmatmul.mubr.msk.f32.gmra.mrb[46].mxu0 %vm710_vm2, %v1447_v56 }
 0x1fc   : > { %v4296_v61 = vpop.f32.mrb[24].mxu0 }
 0x1fd   : > { %v2003_v62 = vadd.f32 %v4296_v61, %v5043_v60  ;;  %v1876_v63 = vpop.f32.mrb[25].mxu0 }
 0x1fe   : > { %v2002_v0 = vadd.f32 %v5043_v60, %v1876_v63 }
 0x1ff   : > { %v2027_v3 = vmax.f32 %v2003_v62, 0.0 }
 0x200   : > { %v2026_v1 = vmax.f32 %v2002_v0, 0.0  ;;  %v4299_v2 = vpop.f32.mrb[26].mxu0 }
 0x201   : > { %v2005_v4 = vadd.f32 %v4299_v2, %v5043_v60  ;;  %v1886_v5 = vpop.f32.mrb[27].mxu0 }
 0x202   : > { %v2004_v6 = vadd.f32 %v5043_v60, %v1886_v5  ;;  %4346 = vmatprep.mubr.msk.f32.mxu1 %vm2065_vm3, %v2026_v1 }
 0x203   : > { %4347 = vmatmul.mubr.msk.f32.vlgmr.msra.gmra.mrb[24].mxu1 %vm2065_vm3, %v2027_v3  ;;  %v2029_v9 = vmax.f32 %v2005_v4, 0.0 }
 0x204   : > { %v2028_v7 = vmax.f32 %v2004_v6, 0.0  ;;  %v4302_v8 = vpop.f32.mrb[28].mxu0  ;;  %v5097_v6 = vld [vmem:[%s5489_s8] ss:$0 sm:$0xff] }
 0x205   : > { %v2007_v10 = vadd.f32 %v4302_v8, %v5043_v60  ;;  %v1896_v11 = vpop.f32.mrb[29].mxu0 }
 0x206   : > { %v2006_v12 = vadd.f32 %v5043_v60, %v1896_v11  ;;  %4349 = vmatprep.mubr.msk.f32.mxu1 %vm2065_vm3, %v2028_v7  ;;  %v5105_v11 = vld [vmem:[%s568_s29] sm:$0xff] }
 0x207   : > { %4350 = vmatmul.mubr.msk.f32.gmra.mrb[26].mxu1 %vm2065_vm3, %v2029_v9  ;;  %v2031_v15 = vmax.f32 %v2007_v10, 0.0  ;;  %v4685_v10 = vmov 0.0|0.0  }
 0x208   : > { %v2030_v13 = vmax.f32 %v2006_v12, 0.0  ;;  %v4305_v14 = vpop.f32.mrb[30].mxu0  ;;  %4544 = vmatprep.subr.bf16.mxu1 %v4685_v10 }
 0x209   : > { %v2009_v16 = vadd.f32 %v4305_v14, %v5043_v60  ;;  %v1906_v17 = vpop.f32.mrb[31].mxu0 }
 0x20a   : > { %v2008_v18 = vadd.f32 %v5043_v60, %v1906_v17  ;;  %4352 = vmatprep.mubr.msk.f32.mxu1 %vm2065_vm3, %v2030_v13 }
 0x20b   : > { %4353 = vmatmul.mubr.msk.f32.gmra.mrb[28].mxu1 %vm2065_vm3, %v2031_v15  ;;  %v2033_v21 = vmax.f32 %v2009_v16, 0.0 }
 0x20c   : > { %v2032_v19 = vmax.f32 %v2008_v18, 0.0  ;;  %v4308_v20 = vpop.f32.mrb[32].mxu0 }
 0x20d   : > { %v2011_v22 = vadd.f32 %v4308_v20, %v5043_v60  ;;  %v1916_v23 = vpop.f32.mrb[33].mxu0 }
 0x20e   : > { %v2010_v24 = vadd.f32 %v5043_v60, %v1916_v23  ;;  %4355 = vmatprep.mubr.msk.f32.mxu1 %vm2065_vm3, %v2032_v19  ;;  %v5112_v19 = vld [vmem:[%s568_s29 + $0x8] sm:$0xff] }
 0x20f   : > { %4356 = vmatmul.mubr.msk.f32.gmra.mrb[30].mxu1 %vm2065_vm3, %v2033_v21  ;;  %v2035_v27 = vmax.f32 %v2011_v22, 0.0  ;;  %v4687_v21 = vmov 0.0  }
 0x210   : > { %v2034_v25 = vmax.f32 %v2010_v24, 0.0  ;;  %v4311_v26 = vpop.f32.mrb[34].mxu0 }
 0x211   : > { %v2013_v28 = vadd.f32 %v4311_v26, %v5043_v60  ;;  %v1926_v29 = vpop.f32.mrb[35].mxu0 }
 0x212   : > { %v2012_v30 = vadd.f32 %v5043_v60, %v1926_v29  ;;  %4358 = vmatprep.mubr.msk.f32.mxu1 %vm2065_vm3, %v2034_v25 }
 0x213   : > { %4359 = vmatmul.mubr.msk.f32.gmra.mrb[32].mxu1 %vm2065_vm3, %v2035_v27  ;;  %v2037_v33 = vmax.f32 %v2013_v28, 0.0  ;;  %v5125_v28 = vld [vmem:[%s568_s29 + $0x10] sm:$0xff] }
 0x214   : > { %v2036_v31 = vmax.f32 %v2012_v30, 0.0  ;;  %v4314_v32 = vpop.f32.mrb[36].mxu0 }
 0x215   : > { %v2015_v34 = vadd.f32 %v4314_v32, %v5043_v60  ;;  %v1936_v35 = vpop.f32.mrb[37].mxu0 }
 0x216   : > { %v2014_v36 = vadd.f32 %v5043_v60, %v1936_v35  ;;  %4361 = vmatprep.mubr.msk.f32.mxu1 %vm2065_vm3, %v2036_v31 }
 0x217   : > { %4362 = vmatmul.mubr.msk.f32.gmra.mrb[34].mxu1 %vm2065_vm3, %v2037_v33  ;;  %v2039_v39 = vmax.f32 %v2015_v34, 0.0 }
 0x218   : > { %v2038_v37 = vmax.f32 %v2014_v36, 0.0  ;;  %v4317_v38 = vpop.f32.mrb[38].mxu0 }
 0x219   : > { %v2017_v40 = vadd.f32 %v4317_v38, %v5043_v60  ;;  %v1946_v41 = vpop.f32.mrb[39].mxu0 }
 0x21a   : > { %v2016_v42 = vadd.f32 %v5043_v60, %v1946_v41  ;;  %4364 = vmatprep.mubr.msk.f32.mxu1 %vm2065_vm3, %v2038_v37 }
 0x21b   : > { %4365 = vmatmul.mubr.msk.f32.gmra.mrb[36].mxu1 %vm2065_vm3, %v2039_v39  ;;  %v2041_v45 = vmax.f32 %v2017_v40, 0.0 }
 0x21c   : > { %v2040_v43 = vmax.f32 %v2016_v42, 0.0  ;;  %v4320_v44 = vpop.f32.mrb[40].mxu0 }
 0x21d   : > { %v2019_v46 = vadd.f32 %v4320_v44, %v5043_v60  ;;  %v1956_v47 = vpop.f32.mrb[41].mxu0 }
 0x21e   : > { %v2018_v48 = vadd.f32 %v5043_v60, %v1956_v47  ;;  %4367 = vmatprep.mubr.msk.f32.mxu1 %vm2065_vm3, %v2040_v43 }
 0x21f   : > { %4368 = vmatmul.mubr.msk.f32.gmra.mrb[38].mxu1 %vm2065_vm3, %v2041_v45  ;;  %v2043_v51 = vmax.f32 %v2019_v46, 0.0 }
 0x220   : > { %v2042_v49 = vmax.f32 %v2018_v48, 0.0  ;;  %v4323_v50 = vpop.f32.mrb[42].mxu0 }
 0x221   : > { %v2021_v52 = vadd.f32 %v4323_v50, %v5043_v60  ;;  %v1966_v53 = vpop.f32.mrb[43].mxu0 }
 0x222   : > { %v2020_v54 = vadd.f32 %v5043_v60, %v1966_v53  ;;  %4370 = vmatprep.mubr.msk.f32.mxu1 %vm2065_vm3, %v2042_v49 }
 0x223   : > { %4371 = vmatmul.mubr.msk.f32.gmra.mrb[40].mxu1 %vm2065_vm3, %v2043_v51  ;;  %v2045_v57 = vmax.f32 %v2021_v52, 0.0 }
 0x224   : > { %v2044_v55 = vmax.f32 %v2020_v54, 0.0  ;;  %v4326_v56 = vpop.f32.mrb[44].mxu0 }
 0x225   : > { %v2023_v58 = vadd.f32 %v4326_v56, %v5043_v60  ;;  %v1976_v59 = vpop.f32.mrb[45].mxu0 }
 0x226   : > { %v2022_v61 = vadd.f32 %v5043_v60, %v1976_v59  ;;  %4373 = vmatprep.mubr.msk.f32.mxu1 %vm2065_vm3, %v2044_v55 }
 0x227   : > { %4374 = vmatmul.mubr.msk.f32.gmra.mrb[42].mxu1 %vm2065_vm3, %v2045_v57  ;;  %v2047_v0 = vmax.f32 %v2023_v58, 0.0 }
 0x228   : > { %v2046_v62 = vmax.f32 %v2022_v61, 0.0  ;;  %v4329_v63 = vpop.f32.mrb[46].mxu0 }
 0x229   : > { %v2025_v1 = vadd.f32 %v4329_v63, %v5043_v60  ;;  %v1986_v2 = vpop.f32.mrb[47].mxu0 }
 0x22a   : > { %v2024_v3 = vadd.f32 %v5043_v60, %v1986_v2  ;;  %4376 = vmatprep.mubr.msk.f32.mxu1 %vm2065_vm3, %v2046_v62 }
 0x22b   : > { %4377 = vmatmul.mubr.msk.f32.gmra.mrb[44].mxu1 %vm2065_vm3, %v2047_v0  ;;  %v2049_v5 = vmax.f32 %v2025_v1, 0.0 }
 0x22c   : > { %v2048_v4 = vmax.f32 %v2024_v3, 0.0 }
 0x22e   : > { %4379 = vmatprep.mubr.msk.f32.mxu1 %vm2065_vm3, %v2048_v4 }
 0x22f   : > { %4380 = vmatmul.mubr.msk.f32.gmra.mrb[46].mxu1 %vm2065_vm3, %v2049_v5 }
 0x230   : > { %4388 = vmatprep.mubr.msk.f32.mxu1 %vm4686_vm4, %v4687_v21 }
 0x2d6   : > { %v4348_v60 = vpop.f32.mrb[24].mxu1 }
 0x2d7   : > { %v2204_v7 = vpop.f32.mrb[25].mxu1  ;;  %v2210_v8 = vadd.f32 %v4348_v60, %v5097_v6 }
 0x2d8   : > { %v2205_v9 = vadd.f32 %v5097_v6, %v2204_v7 }
 0x2d9   : > { %v2324_v16 = vmax.f32 %v2210_v8, 0.0 }
 0x2da   : > { %v2323_v12 = vmax.f32 %v2205_v9, 0.0  ;;  %v4351_v13 = vpop.f32.mrb[26].mxu1 }
 0x2db   : > { %v2220_v14 = vadd.f32 %v4351_v13, %v5097_v6  ;;  %v2214_v15 = vpop.f32.mrb[27].mxu1  ;;  %v5123_v27 = vmul.f32 %v2324_v16, %v5112_v19 }
 0x2dc   : > { %v2215_v17 = vadd.f32 %v5097_v6, %v2214_v15  ;;  %v5110_v18 = vmul.f32 %v2323_v12, %v5105_v11 }
 0x2dd   : > { %v2326_v20 = vmax.f32 %v2220_v14, 0.0 }
 0x2de   : > { %2353 = vrot.lane.b32.xlu0 %v5110_v18, %s4688_s30  ;;  %v4354_v22 = vpop.f32.mrb[28].mxu1  ;;  %v2325_v23 = vmax.f32 %v2215_v17, 0.0 }
 0x2df   : > { %v2230_v24 = vadd.f32 %v4354_v22, %v5097_v6  ;;  %v2224_v25 = vpop.f32.mrb[29].mxu1  ;;  %v5120_v26 = vmul.f32 %v2326_v20, %v5105_v11 }
 0x2e0   : > { %v2225_v29 = vadd.f32 %v5097_v6, %v2224_v25  ;;  %v5133_v32 = vmul.f32 %v2325_v23, %v5125_v28 }
 0x2e1   : > { %2447 = vrot.lane.b32.xlu1 %v5120_v26, %s4688_s30  ;;  %v2328_v33 = vmax.f32 %v2230_v24, 0.0 }
 0x2e2   : > { %v2327_v30 = vmax.f32 %v2225_v29, 0.0  ;;  %2355 = vrot.lane.b32.xlu0 %v5123_v27, %s4688_s30  ;;  %v4357_v31 = vpop.f32.mrb[30].mxu1 }
 0x2e3   : > { %v2240_v34 = vadd.f32 %v4357_v31, %v5097_v6  ;;  %v2234_v35 = vpop.f32.mrb[31].mxu1  ;;  %v5145_v40 = vmul.f32 %v2328_v33, %v5125_v28 }
 0x2e4   : > { %v5137_v36 = vmul.f32 %v2327_v30, %v5112_v19  ;;  %v2235_v37 = vadd.f32 %v5097_v6, %v2234_v35 }
 0x2e5   : > { %2357 = vrot.lane.b32.xlu1 %v5133_v32, %s4688_s30  ;;  %v2330_v41 = vmax.f32 %v2240_v34, 0.0 }
 0x2e6   : > { %v2329_v38 = vmax.f32 %v2235_v37, 0.0  ;;  %2449 = vrot.lane.b32.xlu0 %v5137_v36, %s4688_s30  ;;  %v4360_v39 = vpop.f32.mrb[32].mxu1 }
 0x2e7   : > { %v2250_v42 = vadd.f32 %v4360_v39, %v5097_v6  ;;  %v2244_v43 = vpop.f32.mrb[33].mxu1  ;;  %v5157_v48 = vmul.f32 %v2330_v41, %v5112_v19 }
 0x2e8   : > { %v5149_v44 = vmul.f32 %v2329_v38, %v5105_v11  ;;  %v2245_v45 = vadd.f32 %v5097_v6, %v2244_v43 }
 0x2e9   : > { %2451 = vrot.lane.b32.xlu1 %v5145_v40, %s4688_s30  ;;  %v2332_v49 = vmax.f32 %v2250_v42, 0.0 }
 0x2ea   : > { %v2331_v46 = vmax.f32 %v2245_v45, 0.0  ;;  %2536 = vrot.lane.b32.xlu0 %v5149_v44, %s4688_s30  ;;  %v4363_v47 = vpop.f32.mrb[34].mxu1 }
 0x2eb   : > { %v2260_v50 = vadd.f32 %v4363_v47, %v5097_v6  ;;  %v2254_v51 = vpop.f32.mrb[35].mxu1  ;;  %v5169_v56 = vmul.f32 %v2332_v49, %v5105_v11 }
 0x2ec   : > { %v5161_v52 = vmul.f32 %v2331_v46, %v5125_v28  ;;  %v2255_v53 = vadd.f32 %v5097_v6, %v2254_v51 }
 0x2ed   : > { %2538 = vrot.lane.b32.xlu1 %v5157_v48, %s4688_s30  ;;  %v2334_v57 = vmax.f32 %v2260_v50, 0.0 }
 0x2ee   : > { %v2333_v54 = vmax.f32 %v2255_v53, 0.0  ;;  %2540 = vrot.lane.b32.xlu0 %v5161_v52, %s4688_s30  ;;  %v4366_v55 = vpop.f32.mrb[36].mxu1 }
 0x2ef   : > { %v2270_v58 = vadd.f32 %v4366_v55, %v5097_v6  ;;  %v2264_v59 = vpop.f32.mrb[37].mxu1  ;;  %v5181_v1 = vmul.f32 %v2334_v57, %v5125_v28 }
 0x2f0   : > { %v5173_v61 = vmul.f32 %v2333_v54, %v5112_v19  ;;  %v2265_v62 = vadd.f32 %v5097_v6, %v2264_v59 }
 0x2f1   : > { %2625 = vrot.lane.b32.xlu1 %v5169_v56, %s4688_s30  ;;  %v2336_v2 = vmax.f32 %v2270_v58, 0.0 }
 0x2f2   : > { %v2335_v63 = vmax.f32 %v2265_v62, 0.0  ;;  %2627 = vrot.lane.b32.xlu0 %v5173_v61, %s4688_s30  ;;  %v4369_v0 = vpop.f32.mrb[38].mxu1 }
 0x2f3   : > { %v2280_v3 = vadd.f32 %v4369_v0, %v5097_v6  ;;  %v2274_v4 = vpop.f32.mrb[39].mxu1  ;;  %v5193_v9 = vmul.f32 %v2336_v2, %v5112_v19 }
 0x2f4   : > { %v5185_v5 = vmul.f32 %v2335_v63, %v5105_v11  ;;  %v2275_v60 = vadd.f32 %v5097_v6, %v2274_v4 }
 0x2f5   : > { %2629 = vrot.lane.b32.xlu1 %v5181_v1, %s4688_s30  ;;  %v2338_v12 = vmax.f32 %v2280_v3, 0.0 }
 0x2f6   : > { %v2337_v7 = vmax.f32 %v2275_v60, 0.0  ;;  %2714 = vrot.lane.b32.xlu0 %v5185_v5, %s4688_s30  ;;  %v4372_v8 = vpop.f32.mrb[40].mxu1 }
 0x2f7   : > { %v2290_v13 = vadd.f32 %v4372_v8, %v5097_v6  ;;  %v2284_v14 = vpop.f32.mrb[41].mxu1  ;;  %v5205_v22 = vmul.f32 %v2338_v12, %v5105_v11 }
 0x2f8   : > { %v5197_v15 = vmul.f32 %v2337_v7, %v5125_v28  ;;  %v2285_v16 = vadd.f32 %v5097_v6, %v2284_v14  ;;  %v5264_v7 = vld [vmem:[%s5484_s3] sm:$0xff] }
 0x2f9   : > { %2716 = vrot.lane.b32.xlu1 %v5193_v9, %s4688_s30  ;;  %v2340_v23 = vmax.f32 %v2290_v13, 0.0 }
 0x2fa   : > { %v2339_v17 = vmax.f32 %v2285_v16, 0.0  ;;  %2718 = vrot.lane.b32.xlu0 %v5197_v15, %s4688_s30  ;;  %v4375_v20 = vpop.f32.mrb[42].mxu1 }
 0x2fb   : > { %v2300_v24 = vadd.f32 %v4375_v20, %v5097_v6  ;;  %v2294_v25 = vpop.f32.mrb[43].mxu1  ;;  %v5217_v34 = vmul.f32 %v2340_v23, %v5125_v28 }
 0x2fc   : > { %v5209_v29 = vmul.f32 %v2339_v17, %v5112_v19  ;;  %v2295_v30 = vadd.f32 %v5097_v6, %v2294_v25 }
 0x2fd   : > { %2803 = vrot.lane.b32.xlu1 %v5205_v22, %s4688_s30  ;;  %v2342_v35 = vmax.f32 %v2300_v24, 0.0 }
 0x2fe   : > { %v2341_v31 = vmax.f32 %v2295_v30, 0.0  ;;  %2805 = vrot.lane.b32.xlu0 %v5209_v29, %s4688_s30  ;;  %v4378_v33 = vpop.f32.mrb[44].mxu1 }
 0x2ff   : > { %v2310_v37 = vadd.f32 %v4378_v33, %v5097_v6  ;;  %v2304_v38 = vpop.f32.mrb[45].mxu1  ;;  %v5229_v45 = vmul.f32 %v2342_v35, %v5112_v19 }
 0x300   : > { %v5221_v39 = vmul.f32 %v2341_v31, %v5105_v11  ;;  %v2305_v41 = vadd.f32 %v5097_v6, %v2304_v38 }
 0x301   : > { %2807 = vrot.lane.b32.xlu1 %v5217_v34, %s4688_s30  ;;  %v2344_v46 = vmax.f32 %v2310_v37, 0.0 }
 0x302   : > { %v2343_v42 = vmax.f32 %v2305_v41, 0.0  ;;  %2892 = vrot.lane.b32.xlu0 %v5221_v39, %s4688_s30  ;;  %v4381_v43 = vpop.f32.mrb[46].mxu1 }
 0x303   : > { %v2320_v47 = vadd.f32 %v4381_v43, %v5097_v6  ;;  %v2314_v49 = vpop.f32.mrb[47].mxu1  ;;  %v5241_v54 = vmul.f32 %v2344_v46, %v5105_v11 }
 0x304   : > { %v5233_v50 = vmul.f32 %v2343_v42, %v5125_v28  ;;  %v2315_v51 = vadd.f32 %v5097_v6, %v2314_v49 }
 0x305   : > { %2894 = vrot.lane.b32.xlu1 %v5229_v45, %s4688_s30  ;;  %v2346_v55 = vmax.f32 %v2320_v47, 0.0 }
 0x306   : > { %v2345_v53 = vmax.f32 %v2315_v51, 0.0  ;;  %2896 = vrot.lane.b32.xlu0 %v5233_v50, %s4688_s30 }
 0x307   : > { %v5251_v6 = vmul.f32 %v2346_v55, %v5125_v28  ;;  %v3076_v55 = vld [vmem:[%s5491_s10 + $0x18] sm:$0xff] }
 0x308   : > { %v5244_v57 = vmul.f32 %v2345_v53, %v5112_v19 }
 0x309   : > { %2981 = vrot.lane.b32.xlu1 %v5241_v54, %s4688_s30 }
 0x30a   : > { %2983 = vrot.lane.b32.xlu0 %v5244_v57, %s4688_s30 }
 0x30d   : > { %2985 = vrot.lane.b32.xlu1 %v5251_v6, %s4688_s30 }
 0x350   : > { %v2354_v58 = vpop.permute.xlu0 %2353 }
 0x351   : > { %v2362_v62 = vadd.f32 %v2354_v58, %v5110_v18  ;;  %v3361_v58 = vld [vmem:[%s5493_s12] sm:$0xff] }
 0x353   : > { %v2448_v59 = vpop.permute.xlu1 %2447 }
 0x354   : > { %v2356_v11 = vpop.permute.xlu0 %2355  ;;  %v2456_v28 = vadd.f32 %v2448_v59, %v5120_v26  ;;  %v3362_v59 = vld [vmem:[%s5493_s12 + $0x8] sm:$0xff] }
 0x355   : > { %v2363_v19 = vadd.f32 %v2356_v11, %v5123_v27  ;;  %v4576_v11 = vpack.c.bf16 %v3362_v59, %v3361_v58 }
 0x357   : > { %v4545_v63 = vpack.c.bf16 %v2363_v19, %v2362_v62  ;;  %v2358_v0 = vpop.permute.xlu1 %2357 }
 0x358   : > { %v2450_v2 = vpop.permute.xlu0 %2449  ;;  %v2364_v4 = vadd.f32 %v2358_v0, %v5133_v32 }
 0x359   : > { %v2457_v3 = vadd.f32 %v2450_v2, %v5137_v36  ;;  %4546 = vmatpush3.bf16.msra.mxu1 %v4545_v63 }
 0x35a   : > { %4386 = vmatprep.subr.mxu1 %v4687_v21 }
 0x35b   : > { %v2452_v60 = vpop.permute.xlu1 %2451  ;;  %v4548_v27 = vpack.c.bf16 %v2457_v3, %v2456_v28 }
 0x35c   : > { %v2537_v18 = vpop.permute.xlu0 %2536  ;;  %v2458_v12 = vadd.f32 %v2452_v60, %v5145_v40 }
 0x35d   : > { %4387 = vmatpush3.msra.mxu1 %v2364_v4  ;;  %v2545_v26 = vadd.f32 %v2537_v18, %v5149_v44 }
 0x35e   : > { %4547 = vmatprep.subr.bf16.mxu1 %v4685_v10  ;;  %4389 = vmatmul.mubr.msk.f32.vlgmr.msra.gmra.mrb[48].mxu1 %vm2365_vm5, %v5264_v7 }
 0x35f   : > { %v2539_v36 = vpop.permute.xlu1 %2538  ;;  %4549 = vmatpush3.bf16.msra.mxu1 %v4548_v27  ;;  %4397 = vmatprep.mubr.msk.f32.mxu1 %vm4686_vm4, %v4687_v21 }
 0x360   : > { %v2546_v32 = vadd.f32 %v2539_v36, %v5157_v48  ;;  %v2541_v8 = vpop.permute.xlu0 %2540  ;;  %4395 = vmatprep.subr.mxu1 %v4687_v21 }
 0x361   : > { %v2547_v40 = vadd.f32 %v2541_v8, %v5161_v52 }
 0x362   : > { %v4551_v13 = vpack.c.bf16 %v2546_v32, %v2545_v26 }
 0x363   : > { %v2626_v14 = vpop.permute.xlu1 %2625  ;;  %4396 = vmatpush3.msra.mxu1 %v2458_v12 }
 0x364   : > { %v2628_v16 = vpop.permute.xlu0 %2627  ;;  %4550 = vmatprep.subr.bf16.mxu1 %v4685_v10  ;;  %4398 = vmatmul.mubr.msk.f32.vlgmr.msra.gmra.mrb[50].mxu1 %vm2365_vm5, %v5264_v7  ;;  %v2634_v17 = vadd.f32 %v2626_v14, %v5169_v56 }
 0x365   : > { %v2635_v44 = vadd.f32 %v2628_v16, %v5173_v61  ;;  %4552 = vmatpush3.bf16.msra.mxu1 %v4551_v13  ;;  %4406 = vmatprep.mubr.msk.f32.mxu1 %vm4686_vm4, %v4687_v21 }
 0x366   : > { %4404 = vmatprep.subr.mxu1 %v4687_v21 }
 0x367   : > { %v2630_v48 = vpop.permute.xlu1 %2629  ;;  %v4554_v23 = vpack.c.bf16 %v2635_v44, %v2634_v17 }
 0x368   : > { %v2715_v20 = vpop.permute.xlu0 %2714  ;;  %v2636_v52 = vadd.f32 %v2630_v48, %v5181_v1 }
 0x369   : > { %4405 = vmatpush3.msra.mxu1 %v2547_v40  ;;  %v2723_v61 = vadd.f32 %v2715_v20, %v5185_v5  ;;  %v5369_v20 = vld [vmem:[%s4809_s0] sm:$0xff] }
 0x36a   : > { %4553 = vmatprep.subr.bf16.mxu1 %v4685_v10  ;;  %4407 = vmatmul.mubr.msk.f32.vlgmr.msra.gmra.mrb[52].mxu1 %vm2365_vm5, %v5264_v7 }
 0x36b   : > { %v2717_v56 = vpop.permute.xlu1 %2716  ;;  %4555 = vmatpush3.bf16.msra.mxu1 %v4554_v23  ;;  %4415 = vmatprep.mubr.msk.f32.mxu1 %vm4686_vm4, %v4687_v21  ;;  %v5374_v23 = vld [vmem:[%s4809_s0 + $0x8] sm:$0xff] }
 0x36c   : > { %v2724_v24 = vadd.f32 %v2717_v56, %v5193_v9  ;;  %v2719_v25 = vpop.permute.xlu0 %2718  ;;  %4413 = vmatprep.subr.mxu1 %v4687_v21  ;;  %v5379_v56 = vld [vmem:[%s4809_s0 + $0x10] sm:$0xff] }
 0x36d   : > { %v2725_v1 = vadd.f32 %v2719_v25, %v5197_v15  ;;  %v5394_v25 = vld [vmem:[%s4809_s0 + $0x28] sm:$0xff] }
 0x36e   : > { %v4557_v30 = vpack.c.bf16 %v2724_v24, %v2723_v61  ;;  %v5384_v61 = vld [vmem:[%s4809_s0 + $0x18] sm:$0xff]  ;;  %v5389_v24 = vld [vmem:[%s4809_s0 + $0x20] sm:$0xff] }
 0x36f   : > { %v2804_v31 = vpop.permute.xlu1 %2803  ;;  %4414 = vmatpush3.msra.mxu1 %v2636_v52  ;;  %v5399_v52 = vld [vmem:[%s4809_s0 + $0x30] sm:$0xff] }
 0x370   : > { %v2806_v33 = vpop.permute.xlu0 %2805  ;;  %4556 = vmatprep.subr.bf16.mxu1 %v4685_v10  ;;  %4416 = vmatmul.mubr.msk.f32.vlgmr.msra.gmra.mrb[54].mxu1 %vm2365_vm5, %v5264_v7  ;;  %v2812_v35 = vadd.f32 %v2804_v31, %v5205_v22  ;;  %v3363_v31 = vld [vmem:[%s5493_s12 + $0x10] sm:$0xff] }
 0x371   : > { %v2813_v5 = vadd.f32 %v2806_v33, %v5209_v29  ;;  %4558 = vmatpush3.bf16.msra.mxu1 %v4557_v30  ;;  %4424 = vmatprep.mubr.msk.f32.mxu1 %vm4686_vm4, %v4687_v21  ;;  %v5404_v30 = vld [vmem:[%s4809_s0 + $0x38] sm:$0xff] }
 0x372   : > { %4422 = vmatprep.subr.mxu1 %v4687_v21  ;;  %v3364_v33 = vld [vmem:[%s5493_s12 + $0x18] sm:$0xff] }
 0x373   : > { %v2808_v9 = vpop.permute.xlu1 %2807  ;;  %v4560_v38 = vpack.c.bf16 %v2813_v5, %v2812_v35  ;;  %v4580_v35 = vpack.c.bf16 %v3364_v33, %v3363_v31  ;;  %v3509_v5 = vld [vmem:[%s5495_s14] sm:$0xff] }
 0x374   : > { %v2893_v37 = vpop.permute.xlu0 %2892  ;;  %v2814_v15 = vadd.f32 %v2808_v9, %v5217_v34 }
 0x375   : > { %4423 = vmatpush3.msra.mxu1 %v2725_v1  ;;  %v2901_v29 = vadd.f32 %v2893_v37, %v5221_v39  ;;  %v3510_v1 = vld [vmem:[%s5495_s14 + $0x8] sm:$0xff]  ;;  %v3928_v37 = vld [vmem:[%s5492_s11] ss:$0 sm:$0xff] }
 0x376   : > { %4559 = vmatprep.subr.bf16.mxu1 %v4685_v10  ;;  %4425 = vmatmul.mubr.msk.f32.vlgmr.msra.gmra.mrb[56].mxu1 %vm2365_vm5, %v5264_v7  ;;  %v4584_v9 = vpack.c.bf16 %v3510_v1, %v3509_v5  ;;  %v3938_v5 = vld [vmem:[%s5496_s15] ss:$0 sm:$0xff] }
 0x377   : > { %v2895_v22 = vpop.permute.xlu1 %2894  ;;  %4561 = vmatpush3.bf16.msra.mxu1 %v4560_v38  ;;  %4433 = vmatprep.mubr.msk.f32.mxu1 %vm4686_vm4, %v4687_v21 }
 0x378   : > { %v2902_v41 = vadd.f32 %v2895_v22, %v5229_v45  ;;  %v2897_v42 = vpop.permute.xlu0 %2896  ;;  %4431 = vmatprep.subr.mxu1 %v4687_v21 }
 0x379   : > { %v2903_v34 = vadd.f32 %v2897_v42, %v5233_v50  ;;  %v3073_v50 = vld [vmem:[%s5491_s10] sm:$0xff] }
 0x37a   : > { %v4563_v43 = vpack.c.bf16 %v2902_v41, %v2901_v29 }
 0x37b   : > { %v2982_v46 = vpop.permute.xlu1 %2981  ;;  %4432 = vmatpush3.msra.mxu1 %v2814_v15 }
 0x37c   : > { %4562 = vmatprep.subr.bf16.mxu1 %v4685_v10  ;;  %v2984_v47 = vpop.permute.xlu0 %2983  ;;  %4434 = vmatmul.mubr.msk.f32.vlgmr.msra.gmra.mrb[58].mxu1 %vm2365_vm5, %v5264_v7  ;;  %v2990_v49 = vadd.f32 %v2982_v46, %v5241_v54 }
 0x37d   : > { %v2991_v39 = vadd.f32 %v2984_v47, %v5244_v57  ;;  %4564 = vmatpush3.bf16.msra.mxu1 %v4563_v43  ;;  %4442 = vmatprep.mubr.msk.f32.mxu1 %vm4686_vm4, %v4687_v21 }
 0x37e   : > { %4440 = vmatprep.subr.mxu1 %v4687_v21 }
 0x37f   : > { %v4566_v45 = vpack.c.bf16 %v2991_v39, %v2990_v49  ;;  %v2986_v51 = vpop.permute.xlu1 %2985 }
 0x380   : > { %v2992_v53 = vadd.f32 %v2986_v51, %v5251_v6  ;;  %v3064_v6 = vld [vmem:[%s5490_s9] sm:$0xf] }
 0x381   : > { %4441 = vmatpush3.msra.mxu1 %v2903_v34 }
 0x382   : > { %4565 = vmatprep.subr.bf16.mxu1 %v4685_v10  ;;  %4443 = vmatmul.mubr.msk.f32.vlgmr.msra.gmra.mrb[60].mxu1 %vm2365_vm5, %v5264_v7  ;;  %v3074_v10 = vld [vmem:[%s5491_s10 + $0x8] sm:$0xff] }
 0x383   : > { %4567 = vmatpush3.bf16.msra.mxu1 %v4566_v45  ;;  %4451 = vmatprep.mubr.msk.f32.mxu1 %vm4686_vm4, %v4687_v21  ;;  %v4568_v54 = vpack.c.bf16 %v3074_v10, %v3073_v50 }
 0x384   : > { %4449 = vmatprep.subr.mxu1 %v4687_v21  ;;  %v3075_v21 = vld [vmem:[%s5491_s10 + $0x10] sm:$0xff] }
 0x385   : > { %4569 = vmatprep.subr.bf16.mxu0 %v4568_v54  ;;  %v4572_v57 = vpack.c.bf16 %v3076_v55, %v3075_v21 }
 0x386   : > { %4571 = vmatpush3.bf16.msra.mxu0 %v4568_v54 }
 0x387   : > { %4450 = vmatpush3.msra.mxu1 %v2992_v53  ;;  %4573 = vmatprep.subr.bf16.mxu0 %v4572_v57 }
 0x388   : > { %4452 = vmatmul.mubr.msk.f32.vlgmr.msra.gmra.mrb[62].mxu1 %vm2365_vm5, %v5264_v7  ;;  %4577 = vmatprep.subr.bf16.mxu1 %v4576_v11 }
 0x389   : > { %4579 = vmatpush3.bf16.msra.mxu1 %v4576_v11  ;;  %v3511_v11 = vld [vmem:[%s5495_s14 + $0x10] sm:$0xff] }
 0x38a   : > { %4575 = vmatpush3.bf16.msra.mxu0 %v4572_v57  ;;  %4581 = vmatprep.subr.bf16.mxu1 %v4580_v35 }
 0x38b   : > { %4474 = vmatprep.subr.msk.mxu0 %vm1546_vm1, %v3064_v6 }
 0x38d   : > { %4583 = vmatpush3.bf16.msra.mxu1 %v4580_v35 }
 0x38e   : > { %4585 = vmatprep.subr.bf16.mxu1 %v4584_v9 }
 0x431   : > { %v2435_v62 = vpop.f32.mrb[48].mxu1 }
 0x432   : > { %2440 = vst.msk [vmem:[#allocation4] sm:$0xff] %vm2439_vm6, %v2435_v62  ;;  %v4390_v19 = vpop.f32.mrb[49].mxu1  ;;  %v3512_v62 = vld [vmem:[%s5495_s14 + $0x18] sm:$0xff] }
 0x433   : > { %v4588_v19 = vpack.c.bf16 %v3512_v62, %v3511_v11 }
 0x437   : > { %v2525_v63 = vpop.f32.mrb[50].mxu1 }
 0x438   : > { %2529 = vst.msk [vmem:[#allocation4 + $0x8] sm:$0xff] %vm2439_vm6, %v2525_v63  ;;  %v4399_v0 = vpop.f32.mrb[51].mxu1  ;;  %v3929_v63 = vld [vmem:[%s5494_s13] ss:$0 sm:$0xff] }
 0x439   : > { %v3065_v2 = vld [vmem:[#allocation4] sm:$0xff] }
 0x43a   : > { %4462 = vmatprep.mubr.msk.f32.mxu0 %vm2439_vm6, %v3065_v2 }
 0x43d   : > { %v2614_v3 = vpop.f32.mrb[52].mxu1 }
 0x43e   : > { %2618 = vst.msk [vmem:[#allocation4 + $0x10] sm:$0xff] %vm2439_vm6, %v2614_v3  ;;  %v4408_v28 = vpop.f32.mrb[53].mxu1 }
 0x43f   : > { %v3066_v4 = vld [vmem:[#allocation4 + $0x8] sm:$0xff] }
 0x440   : > { %4463 = vmatmul.mubr.msk.f32.vlgmr.msra.gmra.mrb[48].mxu0 %vm2439_vm6, %v3066_v4 }
 0x441   : > { %4475 = vmatpush3.msk.msra.mxu0 %vm1546_vm1, %v3064_v6 }
 0x443   : > { %v2703_v60 = vpop.f32.mrb[54].mxu1 }
 0x444   : > { %2707 = vst.msk [vmem:[#allocation4 + $0x18] sm:$0xff] %vm2439_vm6, %v2703_v60  ;;  %v4417_v7 = vpop.f32.mrb[55].mxu1 }
 0x445   : > { %v3067_v18 = vld [vmem:[#allocation4 + $0x10] sm:$0xff] }
 0x446   : > { %4465 = vmatprep.mubr.msk.f32.mxu0 %vm2439_vm6, %v3067_v18 }
 0x449   : > { %v2792_v27 = vpop.f32.mrb[56].mxu1 }
 0x44a   : > { %2796 = vst.msk [vmem:[#allocation4 + $0x20] sm:$0xff] %vm2439_vm6, %v2792_v27  ;;  %v4426_v36 = vpop.f32.mrb[57].mxu1 }
 0x44b   : > { %v3068_v26 = vld [vmem:[#allocation4 + $0x18] sm:$0xff] }
 0x44c   : > { %4466 = vmatmul.mubr.msk.f32.gmra.mrb[50].mxu0 %vm2439_vm6, %v3068_v26 }
 0x44f   : > { %v2881_v32 = vpop.f32.mrb[58].mxu1 }
 0x450   : > { %2885 = vst.msk [vmem:[#allocation4 + $0x28] sm:$0xff] %vm2439_vm6, %v2881_v32  ;;  %v4435_v8 = vpop.f32.mrb[59].mxu1 }
 0x451   : > { %v3069_v12 = vld [vmem:[#allocation4 + $0x20] sm:$0xff] }
 0x452   : > { %4468 = vmatprep.mubr.msk.f32.mxu0 %vm2439_vm6, %v3069_v12 }
 0x455   : > { %v2970_v13 = vpop.f32.mrb[60].mxu1 }
 0x456   : > { %2974 = vst.msk [vmem:[#allocation4 + $0x30] sm:$0xff] %vm2439_vm6, %v2970_v13  ;;  %v4444_v14 = vpop.f32.mrb[61].mxu1 }
 0x457   : > { %v3070_v16 = vld [vmem:[#allocation4 + $0x28] sm:$0xff] }
 0x458   : > { %4469 = vmatmul.mubr.msk.f32.gmra.mrb[52].mxu0 %vm2439_vm6, %v3070_v16 }
 0x45b   : > { %v3059_v17 = vpop.f32.mrb[62].mxu1 }
 0x45c   : > { %3063 = vst.msk [vmem:[#allocation4 + $0x38] sm:$0xff] %vm2439_vm6, %v3059_v17  ;;  %v4453_v44 = vpop.f32.mrb[63].mxu1 }
 0x45d   : > { %v3071_v40 = vld [vmem:[#allocation4 + $0x30] sm:$0xff] }
 0x45e   : > { %4471 = vmatprep.mubr.msk.f32.mxu0 %vm2439_vm6, %v3071_v40 }
 0x463   : > { %v3072_v48 = vld [vmem:[#allocation4 + $0x38] sm:$0xff] }
 0x464   : > { %4472 = vmatmul.mubr.msk.f32.gmra.mrb[54].mxu0 %vm2439_vm6, %v3072_v48 }
 0x465   : > { %4476 = vmatprep.mubr.msk.f32.mxu0 %vm710_vm2, %v5369_v20 }
 0x468   : > { %4477 = vmatmul.mubr.msk.f32.vlgmr.msra.gmra.mrb[48].mxu0 %vm710_vm2, %v5374_v23 }
 0x469   : > { %4479 = vmatprep.mubr.msk.f32.mxu0 %vm710_vm2, %v5379_v56 }
 0x46c   : > { %4480 = vmatmul.mubr.msk.f32.gmra.mrb[50].mxu0 %vm710_vm2, %v5384_v61 }
 0x46d   : > { %4482 = vmatprep.mubr.msk.f32.mxu0 %vm710_vm2, %v5389_v24 }
 0x470   : > { %4483 = vmatmul.mubr.msk.f32.gmra.mrb[52].mxu0 %vm710_vm2, %v5394_v25 }
 0x471   : > { %4485 = vmatprep.mubr.msk.f32.mxu0 %vm710_vm2, %v5399_v52 }
 0x474   : > { %4486 = vmatmul.mubr.msk.f32.gmra.mrb[54].mxu0 %vm710_vm2, %v5404_v30 }
 0x53b   : > { %v4478_v38 = vpop.f32.mrb[48].mxu0 }
 0x53c   : > { %v3346_v22 = vadd.f32 %v4478_v38, %v3928_v37  ;;  %v3299_v29 = vpop.f32.mrb[49].mxu0 }
 0x53d   : > { %v3345_v41 = vadd.f32 %v3928_v37, %v3299_v29 }
 0x53e   : > { %v3354_v43 = vmax.f32 %v3346_v22, 0.0 }
 0x53f   : > { %v3353_v42 = vmax.f32 %v3345_v41, 0.0  ;;  %v4481_v15 = vpop.f32.mrb[50].mxu0 }
 0x540   : > { %v3348_v46 = vadd.f32 %v4481_v15, %v3928_v37  ;;  %v3309_v47 = vpop.f32.mrb[51].mxu0 }
 0x541   : > { %4496 = vmatprep.mubr.msk.f32.mxu1 %vm2439_vm6, %v3353_v42  ;;  %v3347_v49 = vadd.f32 %v3928_v37, %v3309_v47 }
 0x542   : > { %4497 = vmatmul.mubr.msk.f32.vlgmr.msra.gmra.mrb[64].mxu1 %vm2439_vm6, %v3354_v43  ;;  %v3356_v45 = vmax.f32 %v3348_v46, 0.0 }
 0x543   : > { %v3355_v39 = vmax.f32 %v3347_v49, 0.0  ;;  %v4484_v34 = vpop.f32.mrb[52].mxu0  ;;  %4587 = vmatpush3.bf16.msra.mxu1 %v4584_v9 }
 0x544   : > { %v3350_v51 = vadd.f32 %v4484_v34, %v3928_v37  ;;  %v3319_v53 = vpop.f32.mrb[53].mxu0  ;;  %4589 = vmatprep.subr.bf16.mxu1 %v4588_v19 }
 0x545   : > { %4499 = vmatprep.mubr.msk.f32.mxu1 %vm2439_vm6, %v3355_v39  ;;  %v3349_v50 = vadd.f32 %v3928_v37, %v3319_v53 }
 0x546   : > { %4500 = vmatmul.mubr.msk.f32.gmra.mrb[66].mxu1 %vm2439_vm6, %v3356_v45  ;;  %v3358_v21 = vmax.f32 %v3350_v51, 0.0 }
 0x547   : > { %v3357_v10 = vmax.f32 %v3349_v50, 0.0  ;;  %v4487_v54 = vpop.f32.mrb[54].mxu0  ;;  %4591 = vmatpush3.bf16.msra.mxu1 %v4588_v19 }
 0x548   : > { %v3352_v55 = vadd.f32 %v4487_v54, %v3928_v37  ;;  %v3329_v57 = vpop.f32.mrb[55].mxu0 }
 0x549   : > { %4502 = vmatprep.mubr.msk.f32.mxu1 %vm2439_vm6, %v3357_v10  ;;  %v3351_v6 = vadd.f32 %v3928_v37, %v3329_v57 }
 0x54a   : > { %4503 = vmatmul.mubr.msk.f32.gmra.mrb[68].mxu1 %vm2439_vm6, %v3358_v21  ;;  %v3360_v59 = vmax.f32 %v3352_v55, 0.0 }
 0x54b   : > { %v3359_v58 = vmax.f32 %v3351_v6, 0.0 }
 0x54d   : > { %4505 = vmatprep.mubr.msk.f32.mxu1 %vm2439_vm6, %v3359_v58 }
 0x54e   : > { %4506 = vmatmul.mubr.msk.f32.gmra.mrb[70].mxu1 %vm2439_vm6, %v3360_v59 }
 0x615   : > { %v4498_v0 = vpop.f32.mrb[64].mxu1 }
 0x616   : > { %v3468_v2 = vadd.f32 %v4498_v0, %v3929_v63  ;;  %v3462_v3 = vpop.f32.mrb[65].mxu1 }
 0x617   : > { %v3463_v28 = vadd.f32 %v3929_v63, %v3462_v3 }
 0x618   : > { %v3502_v7 = vmax.f32 %v3468_v2, 0.0 }
 0x619   : > { %v3501_v4 = vmax.f32 %v3463_v28, 0.0  ;;  %v4501_v60 = vpop.f32.mrb[66].mxu1 }
 0x61a   : > { %v3478_v18 = vadd.f32 %v4501_v60, %v3929_v63  ;;  %v3472_v27 = vpop.f32.mrb[67].mxu1 }
 0x61b   : > { %4516 = vmatprep.mubr.msk.f32.mxu1 %vm2439_vm6, %v3501_v4  ;;  %v3473_v36 = vadd.f32 %v3929_v63, %v3472_v27 }
 0x61c   : > { %4517 = vmatmul.mubr.msk.f32.vlgmr.msra.gmra.mrb[72].mxu1 %vm2439_vm6, %v3502_v7  ;;  %v3504_v8 = vmax.f32 %v3478_v18, 0.0 }
 0x61d   : > { %v3503_v26 = vmax.f32 %v3473_v36, 0.0  ;;  %v4504_v32 = vpop.f32.mrb[68].mxu1 }
 0x61e   : > { %v3488_v12 = vadd.f32 %v4504_v32, %v3929_v63  ;;  %v3482_v13 = vpop.f32.mrb[69].mxu1 }
 0x61f   : > { %4519 = vmatprep.mubr.msk.f32.mxu1 %vm2439_vm6, %v3503_v26  ;;  %v3483_v14 = vadd.f32 %v3929_v63, %v3482_v13 }
 0x620   : > { %4520 = vmatmul.mubr.msk.f32.gmra.mrb[74].mxu1 %vm2439_vm6, %v3504_v8  ;;  %v3506_v44 = vmax.f32 %v3488_v12, 0.0 }
 0x621   : > { %v3505_v16 = vmax.f32 %v3483_v14, 0.0  ;;  %v4507_v17 = vpop.f32.mrb[70].mxu1 }
 0x622   : > { %v3498_v40 = vadd.f32 %v4507_v17, %v3929_v63  ;;  %v3492_v48 = vpop.f32.mrb[71].mxu1 }
 0x623   : > { %4522 = vmatprep.mubr.msk.f32.mxu1 %vm2439_vm6, %v3505_v16  ;;  %v3493_v31 = vadd.f32 %v3929_v63, %v3492_v48 }
 0x624   : > { %4523 = vmatmul.mubr.msk.f32.gmra.mrb[76].mxu1 %vm2439_vm6, %v3506_v44  ;;  %v3508_v35 = vmax.f32 %v3498_v40, 0.0 }
 0x625   : > { %v3507_v33 = vmax.f32 %v3493_v31, 0.0 }
 0x627   : > { %4525 = vmatprep.mubr.msk.f32.mxu1 %vm2439_vm6, %v3507_v33 }
 0x628   : > { %4526 = vmatmul.mubr.msk.f32.gmra.mrb[78].mxu1 %vm2439_vm6, %v3508_v35 }
 0x6ef   : > { %v4518_v1 = vpop.f32.mrb[72].mxu1 }
 0x6f0   : > { %v3616_v9 = vadd.f32 %v4518_v1, %v3938_v5  ;;  %v3610_v37 = vpop.f32.mrb[73].mxu1 }
 0x6f1   : > { %v3611_v38 = vadd.f32 %v3938_v5, %v3610_v37 }
 0x6f2   : > { %v3650_v22 = vadd.f32 %v5374_v23, %v3616_v9 }
 0x6f3   : > { %v3649_v29 = vadd.f32 %v5369_v20, %v3611_v38  ;;  %v4521_v41 = vpop.f32.mrb[74].mxu1 }
 0x6f4   : > { %3658 = vst.msk [vmem:[%s577_s26 + $0x8] sm:$0xff] %vm710_vm2, %v3650_v22  ;;  %v3626_v42 = vadd.f32 %v4521_v41, %v3938_v5  ;;  %v3620_v15 = vpop.f32.mrb[75].mxu1 }
 0x6f5   : > { %3657 = vst.msk [vmem:[%s577_s26] sm:$0xff] %vm710_vm2, %v3649_v29  ;;  %v3621_v43 = vadd.f32 %v3938_v5, %v3620_v15 }
 0x6f6   : > { %v3652_v46 = vadd.f32 %v5384_v61, %v3626_v42 }
 0x6f7   : > { %v3651_v47 = vadd.f32 %v5379_v56, %v3621_v43  ;;  %v4524_v49 = vpop.f32.mrb[76].mxu1 }
 0x6f8   : > { %3660 = vst.msk [vmem:[%s577_s26 + $0x18] sm:$0xff] %vm710_vm2, %v3652_v46  ;;  %v3636_v39 = vadd.f32 %v4524_v49, %v3938_v5  ;;  %v3630_v34 = vpop.f32.mrb[77].mxu1 }
 0x6f9   : > { %3659 = vst.msk [vmem:[%s577_s26 + $0x10] sm:$0xff] %vm710_vm2, %v3651_v47  ;;  %v3631_v20 = vadd.f32 %v3938_v5, %v3630_v34 }
 0x6fa   : > { %v3654_v23 = vadd.f32 %v5394_v25, %v3636_v39 }
 0x6fb   : > { %v3653_v45 = vadd.f32 %v5389_v24, %v3631_v20  ;;  %v4527_v51 = vpop.f32.mrb[78].mxu1 }
 0x6fc   : > { %3662 = vst.msk [vmem:[%s577_s26 + $0x28] sm:$0xff] %vm710_vm2, %v3654_v23  ;;  %v3646_v53 = vadd.f32 %v4527_v51, %v3938_v5  ;;  %v3640_v50 = vpop.f32.mrb[79].mxu1 }
 0x6fd   : > { %3661 = vst.msk [vmem:[%s577_s26 + $0x20] sm:$0xff] %vm710_vm2, %v3653_v45  ;;  %v3641_v56 = vadd.f32 %v3938_v5, %v3640_v50 }
 0x6fe   : > { %v3656_v61 = vadd.f32 %v5404_v30, %v3646_v53 }
 0x6ff   : > { %v3655_v10 = vadd.f32 %v5399_v52, %v3641_v56 }
 0x700   : > { %3664 = vst.msk [vmem:[%s577_s26 + $0x38] sm:$0xff] %vm710_vm2, %v3656_v61 }
 0x701   : > { %3663 = vst.msk [vmem:[%s577_s26 + $0x30] sm:$0xff] %vm710_vm2, %v3655_v10 }
 0x702 PF: > { %s26_s23 = sadd.s32 1, %s4683_s23   ;;  %s5502_s21 = smov %s4679_s22 }
 0x703   : > { %p23_p5 = scmp.ge.s32.totalorder %s26_s23, 4   ;;  %s5503_s22 = smov %s5505_s24 }
 0x705   :  { %25 = sbr.rel (!%p23_p5) target bundleno = 2 (0x2), region = 117 }

</bundles_post_ra>
